<compile_context>
chip_gen: v7x
topology: tpu7x:2x2x1
jax: 0.10.0
libtpu: 0.0.40
codegen_flags: <defaults>
</compile_context>

<pallas_src>
import math

import jax
import jax.numpy as jnp
from jax.experimental import pallas as pl
from jax.experimental.pallas import tpu as pltpu


# ----------------------------------------------------------------------------
# Fused kernel: 1x1 conv (channel matmul) + folded BN + SiLU + CTC Linear
# Layout inside kernel: rows = (b, h, w) spatial positions on sublanes,
#                       channels (512) on lanes.
# ----------------------------------------------------------------------------
def fused_head_kernel(x_ref, w_ref, scale_ref, shift_ref, bd_ref, bias_ref, o_ref):
    # 1x1 conv as a channel matmul: bf16 operands, f32 accumulate on the MXU.
    acc = jnp.dot(x_ref[...], w_ref[...], preferred_element_type=jnp.float32)
    # Folded eval-mode BatchNorm2d + SiLU, broadcast along the lane (channel) axis.
    y = acc * scale_ref[...] + shift_ref[...]
    feat = y * jax.nn.sigmoid(y)
    # CTC Linear over the width axis == block-diagonal matmul over rows:
    # rows of each (b, h) group are W consecutive rows, bd = kron(I, pred_w).
    pred = jnp.dot(bd_ref[...], feat.astype(bd_ref.dtype),
                   preferred_element_type=jnp.float32)
    o_ref[...] = (pred + bias_ref[...]).astype(o_ref.dtype)


def _pick_row_tile(M, W):
    """Row-tile size: keep each (b,h) group of W rows intact; tile only if M large."""
    if M <= 512:
        return M
    step = (8 * W) // math.gcd(8, W)
    best = M
    t = step
    while t <= 512:
        if M % t == 0:
            best = t
        t += step
    return best


# ----------------------------------------------------------------------------
# Model forward (Trans='None', Feat=effnet head, Seq='None', Pred='CTC')
# ----------------------------------------------------------------------------
def model_forward(params, backbone_features, text=None, is_train=True):
    # Transformation stage: 'None' -> passthrough
    x = backbone_features
    B, Cin, H, W = x.shape
    conv_w = params["conv_w"]
    Cout = conv_w.shape[0]
    num_class = params["pred_w"].shape[0]
    assert num_class == W, "CTC Linear(num_class) applies over the feature width"

    M = B * H * W
    TM = _pick_row_tile(M, W)
    assert M % TM == 0 and TM % W == 0
    G = TM // W  # (b, h) groups per row tile

    # NCHW -> channel-last 2-D slab; bf16 operands for the MXU (f32 accumulate).
    x2d = jnp.transpose(x, (0, 2, 3, 1)).reshape(M, Cin).astype(jnp.bfloat16)
    wt = jnp.transpose(conv_w, (1, 0)).astype(jnp.bfloat16)            # (Cin, Cout)
    scale2d = params["bn_scale"].reshape(1, Cout).astype(jnp.float32)
    shift2d = params["bn_shift"].reshape(1, Cout).astype(jnp.float32)
    # Block-diagonal CTC weight (shared by every row tile) and per-row bias.
    bd = jnp.kron(jnp.eye(G, dtype=jnp.float32),
                  params["pred_w"]).astype(jnp.bfloat16)               # (TM, TM)
    bias_rows = jnp.tile(params["pred_b"], G).reshape(TM, 1).astype(jnp.float32)

    out2d = pl.pallas_call(
        fused_head_kernel,
        out_shape=jax.ShapeDtypeStruct((M, Cout), jnp.float32),
        grid=(M // TM,),
        in_specs=[
            pl.BlockSpec((TM, Cin), lambda m: (m, 0)),     # x rows tile
            pl.BlockSpec((Cin, Cout), lambda m: (0, 0)),   # conv weight (resident)
            pl.BlockSpec((1, Cout), lambda m: (0, 0)),     # BN scale
            pl.BlockSpec((1, Cout), lambda m: (0, 0)),     # BN shift
            pl.BlockSpec((TM, TM), lambda m: (0, 0)),      # block-diag CTC weight
            pl.BlockSpec((TM, 1), lambda m: (0, 0)),       # CTC bias per row
        ],
        out_specs=pl.BlockSpec((TM, Cout), lambda m: (m, 0)),
        compiler_params=pltpu.CompilerParams(
            dimension_semantics=("parallel",)),
    )(x2d, wt, scale2d, shift2d, bd, bias_rows)

    # Rows are (b, h, v); back to the module's output layout (B, Cout, H, num_class).
    return jnp.transpose(out2d.reshape(B, H, W, Cout), (0, 3, 1, 2))


# ----------------------------------------------------------------------------
# Parameter construction (deterministic, in-script) and pure-JAX reference
# ----------------------------------------------------------------------------
def init_params(key, *, c_in=1280, c_out=512, num_class=8, eps=1e-3):
    k = jax.random.split(key, 7)
    conv_w = 0.02 * jax.random.normal(k[0], (c_out, c_in), jnp.float32)   # 1x1 conv
    gamma = 0.5 + jax.random.uniform(k[1], (c_out,), jnp.float32)         # BN weight
    beta = 0.1 * jax.random.normal(k[2], (c_out,), jnp.float32)           # BN bias
    run_mean = 0.1 * jax.random.normal(k[3], (c_out,), jnp.float32)
    run_var = 0.5 + jax.random.uniform(k[4], (c_out,), jnp.float32)
    # fold eval-mode BN into scale/shift:  y = x*scale + shift
    bn_scale = gamma * jax.lax.rsqrt(run_var + eps)
    bn_shift = beta - run_mean * bn_scale
    pred_w = 0.1 * jax.random.normal(k[5], (num_class, num_class), jnp.float32)
    pred_b = 0.1 * jax.random.normal(k[6], (num_class,), jnp.float32)
    return dict(conv_w=conv_w, bn_scale=bn_scale, bn_shift=bn_shift,
                pred_w=pred_w, pred_b=pred_b)


def _reference_forward(params, x):
    """Pure-JAX f32 reference of the same forward (for a loose-tolerance check)."""
    xh = jnp.transpose(x, (0, 2, 3, 1))                         # (B,H,W,Cin)
    y = jnp.einsum("bhwc,oc->bhwo", xh, params["conv_w"])       # 1x1 conv
    y = y * params["bn_scale"] + params["bn_shift"]             # folded BN
    y = y * jax.nn.sigmoid(y)                                   # SiLU
    feat = jnp.transpose(y, (0, 3, 1, 2))                       # (B,Cout,H,W)
    return jnp.einsum("bchw,vw->bchv", feat, params["pred_w"]) + params["pred_b"]


if __name__ == "__main__":
    key = jax.random.PRNGKey(0)
    k_param, k_x = jax.random.split(key)

    B, Cin, H, W = 2, 1280, 2, 8          # backbone feature map (NCHW); num_class = W
    params = init_params(k_param, c_in=Cin, c_out=512, num_class=W)
    x = jax.random.normal(k_x, (B, Cin, H, W), jnp.float32)
    text = jnp.zeros((B, 10), jnp.int32)  # unused by the CTC branch

    fwd = jax.jit(model_forward, static_argnames=("is_train",))
    out = jax.block_until_ready(fwd(params, x, text))
    assert out.shape == (B, 512, H, W) and out.dtype == jnp.float32

    # Loose-tolerance check vs f32 reference (bf16 MXU operands, f32 accumulation).
    ref = _reference_forward(params, x)
    err = float(jnp.max(jnp.abs(out - ref)))
    assert err < 0.25, f"max abs err {err}"
    print("KERNEL_OK")
</pallas_src>

<mosaic_0001>
module attributes {stable_mosaic.version = 11 : i64} {
  func.func @fused_head_kernel(%arg0: i32, %arg1: memref<32x1280xbf16, #tpu.memory_space<vmem>>, %arg2: memref<1280x512xbf16, #tpu.memory_space<vmem>>, %arg3: memref<1x512xf32, #tpu.memory_space<vmem>>, %arg4: memref<1x512xf32, #tpu.memory_space<vmem>>, %arg5: memref<32x32xbf16, #tpu.memory_space<vmem>>, %arg6: memref<32x1xf32, #tpu.memory_space<vmem>>, %arg7: memref<32x512xf32, #tpu.memory_space<vmem>>) attributes {dimension_semantics = [#tpu.dimension_semantics<parallel>], iteration_bounds = array<i64: 1>, scalar_prefetch = 0 : i64, scratch_operands = 0 : i64, tpu.core_type = #tpu.core_type<tc>, window_params = [{transform_indices = @transform_0, window_bounds = array<i64: 32, 1280>}, {pipeline_mode = #tpu.pipeline_mode<synchronous>, transform_indices = @transform_1, window_bounds = array<i64: 1280, 512>}, {pipeline_mode = #tpu.pipeline_mode<synchronous>, transform_indices = @transform_2, window_bounds = array<i64: 1, 512>}, {pipeline_mode = #tpu.pipeline_mode<synchronous>, transform_indices = @transform_3, window_bounds = array<i64: 1, 512>}, {pipeline_mode = #tpu.pipeline_mode<synchronous>, transform_indices = @transform_4, window_bounds = array<i64: 32, 32>}, {pipeline_mode = #tpu.pipeline_mode<synchronous>, transform_indices = @transform_5, window_bounds = array<i64: 32, 1>}, {transform_indices = @transform_6, window_bounds = array<i64: 32, 512>}]} {
    %c0 = arith.constant 0 : index
    %c0_0 = arith.constant 0 : index
    %0 = vector.load %arg1[%c0, %c0_0] : memref<32x1280xbf16, #tpu.memory_space<vmem>>, vector<32x1280xbf16>
    %c0_1 = arith.constant 0 : index
    %c0_2 = arith.constant 0 : index
    %1 = vector.load %arg2[%c0_1, %c0_2] : memref<1280x512xbf16, #tpu.memory_space<vmem>>, vector<1280x512xbf16>
    %cst = arith.constant dense<0.000000e+00> : vector<32x512xf32>
    %2 = tpu.matmul %0, %1, %cst {dimension_numbers = #tpu.dot_dimension_numbers<[1], [0], [0], [1], [0, 0, 1, 1], [], []>} : vector<32x1280xbf16>, vector<1280x512xbf16>, vector<32x512xf32> -> vector<32x512xf32>
    %c0_3 = arith.constant 0 : index
    %c0_4 = arith.constant 0 : index
    %3 = vector.load %arg3[%c0_3, %c0_4] : memref<1x512xf32, #tpu.memory_space<vmem>>, vector<1x512xf32>
    %4 = vector.broadcast %3 : vector<1x512xf32> to vector<32x512xf32>
    %5 = arith.mulf %2, %4 : vector<32x512xf32>
    %c0_5 = arith.constant 0 : index
    %c0_6 = arith.constant 0 : index
    %6 = vector.load %arg4[%c0_5, %c0_6] : memref<1x512xf32, #tpu.memory_space<vmem>>, vector<1x512xf32>
    %7 = vector.broadcast %6 : vector<1x512xf32> to vector<32x512xf32>
    %8 = arith.addf %5, %7 : vector<32x512xf32>
    %9 = arith.negf %8 : vector<32x512xf32>
    %10 = math.exp %9 : vector<32x512xf32>
    %cst_7 = arith.constant 1.000000e+00 : f32
    %11 = vector.broadcast %cst_7 : f32 to vector<32x512xf32>
    %12 = arith.addf %11, %10 : vector<32x512xf32>
    %13 = arith.divf %11, %12 : vector<32x512xf32>
    %14 = arith.mulf %8, %13 : vector<32x512xf32>
    %c0_8 = arith.constant 0 : index
    %c0_9 = arith.constant 0 : index
    %15 = vector.load %arg5[%c0_8, %c0_9] : memref<32x32xbf16, #tpu.memory_space<vmem>>, vector<32x32xbf16>
    %16 = arith.truncf %14 : vector<32x512xf32> to vector<32x512xbf16>
    %cst_10 = arith.constant dense<0.000000e+00> : vector<32x512xf32>
    %17 = tpu.matmul %15, %16, %cst_10 {dimension_numbers = #tpu.dot_dimension_numbers<[1], [0], [0], [1], [0, 0, 1, 1], [], []>} : vector<32x32xbf16>, vector<32x512xbf16>, vector<32x512xf32> -> vector<32x512xf32>
    %c0_11 = arith.constant 0 : index
    %c0_12 = arith.constant 0 : index
    %18 = vector.load %arg6[%c0_11, %c0_12] : memref<32x1xf32, #tpu.memory_space<vmem>>, vector<32x1xf32>
    %19 = vector.broadcast %18 : vector<32x1xf32> to vector<32x512xf32>
    %20 = arith.addf %17, %19 : vector<32x512xf32>
    %c0_13 = arith.constant 0 : index
    %c0_14 = arith.constant 0 : index
    %21 = vector.load %arg7[%c0_13, %c0_14] : memref<32x512xf32, #tpu.memory_space<vmem>>, vector<32x512xf32>
    tpu.vector_store %arg7[%c0_13, %c0_14], %20 {strides = array<i32>} : memref<32x512xf32, #tpu.memory_space<vmem>>, vector<32x512xf32>,
    return
  }
  func.func @transform_0(%arg0: i32) -> (i32, i32) {
    %c0_i32 = arith.constant 0 : i32
    %c0_i32_0 = arith.constant 0 : i32
    return %arg0, %c0_i32 : i32, i32
  }
  func.func @transform_1(%arg0: i32) -> (i32, i32) {
    %c0_i32 = arith.constant 0 : i32
    %c0_i32_0 = arith.constant 0 : i32
    %c0_i32_1 = arith.constant 0 : i32
    return %c0_i32, %c0_i32_0 : i32, i32
  }
  func.func @transform_2(%arg0: i32) -> (i32, i32) {
    %c0_i32 = arith.constant 0 : i32
    %c0_i32_0 = arith.constant 0 : i32
    %c0_i32_1 = arith.constant 0 : i32
    return %c0_i32, %c0_i32_0 : i32, i32
  }
  func.func @transform_3(%arg0: i32) -> (i32, i32) {
    %c0_i32 = arith.constant 0 : i32
    %c0_i32_0 = arith.constant 0 : i32
    %c0_i32_1 = arith.constant 0 : i32
    return %c0_i32, %c0_i32_0 : i32, i32
  }
  func.func @transform_4(%arg0: i32) -> (i32, i32) {
    %c0_i32 = arith.constant 0 : i32
    %c0_i32_0 = arith.constant 0 : i32
    %c0_i32_1 = arith.constant 0 : i32
    return %c0_i32, %c0_i32_0 : i32, i32
  }
  func.func @transform_5(%arg0: i32) -> (i32, i32) {
    %c0_i32 = arith.constant 0 : i32
    %c0_i32_0 = arith.constant 0 : i32
    %c0_i32_1 = arith.constant 0 : i32
    return %c0_i32, %c0_i32_0 : i32, i32
  }
  func.func @transform_6(%arg0: i32) -> (i32, i32) {
    %c0_i32 = arith.constant 0 : i32
    %c0_i32_0 = arith.constant 0 : i32
    return %arg0, %c0_i32 : i32, i32
  }
}

</mosaic_0001>

<bundles_post_ra>
// kernel: tile.8
= control target key start
LH: loop header
LB: loop body
LE: loop exit
PB: predicated region body
PF: predicated region fallthrough
CT: control target
= control target key end

     0   :  { %2 = vsyncpa [#allocation1], 0  ;;  %s44_s6 = smov [#allocation0]   ;;  %s70_s0 = inlined_call_operand.hbm [shape: f32[8], index: 0, kind: input, shape index: {}]   ;;  %s71_s1 = inlined_call_operand.vmem [shape: f32[4,8], index: 1, kind: output, shape index: {}]  }
   0x1   :  { %s9_s7 = sshll.u32 %s44_s6, 4  ;;  %s20_s10 = scalar_lea.hbm %s70_s0, 16  ;;  %s10_s7 = int_to_ptr.vmem [resolvable:$true] %s9_s7 }
   0x2   :  { %p21_p0 = scmp.ne.s32.totalorder %s70_s0, %s20_s10  ;;  %p24_p1 = scmp.lt.u32.totalorder %s20_s10, %s70_s0 }
   0x4   :  { %p26_p2 = pnand %p24_p1, %p21_p0 }
   0x6   :  { %29 = shalt.err (!%p26_p2)
}
   0x7   :  { %s30_s15 = scalar_lea.vmem %s10_s7, 16  ;;  %s34_s16 = scalar_lea.vmem %s10_s7, 32 }
   0x8   :  { %p31_p3 = scmp.ne.s32.totalorder %s10_s7, %s30_s15  ;;  %p35_p4 = scmp.lt.s32.totalorder %s10_s7, %s10_s7 }
   0x9   :  { %p36_p5 = scmp.lt.s32.totalorder %s34_s16, %s30_s15 }
   0xb   :  { %p37_p6 = por %p36_p5, %p35_p4 }
   0xd   :  { %p38_p7 = pnand %p37_p6, %p31_p3 }
   0xf   :  { %41 = shalt.err (!%p38_p7)
}
  0x10   :  { %12 = dma.hbm_to_vmem [thread:$0]  %s70_s0, 16, %s10_s7, [#allocation1]  }
  0x11   :  { %42 = dma.done.wait [#allocation1], 16  }
  0x12   :  { %43 = vsyncadd [#allocation1], 4294967280  ;;  %v16_v0 = vld [vmem:[#allocation0] ss:$0 sm:$0xff] }
  0x13   :  { %17 = vst [vmem:[%s71_s1] sm:$0xf] %v16_v0 }
  0x14   :  { %18 = vsyncpa [#allocation1], 1 }

// kernel: tile.0
= control target key start
LH: loop header
LB: loop body
LE: loop exit
PB: predicated region body
PF: predicated region fallthrough
CT: control target
= control target key end

     0   :  { %s66_s8 = smov 125   ;;  %vm7_vm0 = vcmask 7168   ;;  %s67_s11 = smov 126   ;;  %s117_s0 = inlined_call_operand.vmem [shape: f32[4,8], index: 0, kind: input, shape index: {}]   ;;  %s118_s1 = inlined_call_operand.vmem [shape: f32[32,1], index: 1, kind: output, shape index: {}]  }
   0x1   :  { %v4_v0 = vld [vmem:[%s117_s0] sm:$0xf]  ;;  %s65_s0 = smov 127   ;;  %s68_s12 = smov 124  }
   0x2   :  { %5 = vst [vmem:[#allocation0] sm:$0xf] %v4_v0  ;;  %s69_s13 = smov 123   ;;  %s70_s14 = smov 122  }
   0x3   :  { %s71_s15 = smov 121  }
   0x9   :  { %v9_v1 = vld [vmem:[#allocation0] sm:$0xf]  }
   0xa   :  { %v21_v2 = vld [vmem:[#allocation0] sm:$0xf]   ;;  %10 = vrot.lane.b32.xlu0 %v9_v1, %s65_s0 }
   0xb   :  { %22 = vrot.lane.b32.xlu1 %v21_v2, %s66_s8  ;;  %v15_v3 = vld [vmem:[#allocation0] sm:$0xf]  }
   0xc   :  { %v27_v4 = vld [vmem:[#allocation0] sm:$0xf]  }
   0xd   :  { %v6_v5 = vld [vmem:[#allocation0] sm:$0xf]  }
   0xe   :  { %8 = vst.msk [vmem:[%s118_s1] ss:$8 sm:$0xf] %vm7_vm0, %v6_v5   ;;  %16 = vrot.lane.b32.xlu0 %v15_v3, %s67_s11  ;;  %v33_v6 = vld [vmem:[#allocation0] sm:$0xf]  }
   0xf   :  { %28 = vrot.lane.b32.xlu1 %v27_v4, %s68_s12  ;;  %v39_v7 = vld [vmem:[#allocation0] sm:$0xf]  }
  0x10   :  { %v45_v8 = vld [vmem:[#allocation0] sm:$0xf]  }
  0x12   :  { %34 = vrot.lane.b32.xlu0 %v33_v6, %s69_s13 }
  0x13   :  { %40 = vrot.lane.b32.xlu1 %v39_v7, %s70_s14 }
  0x16   :  { %46 = vrot.lane.b32.xlu0 %v45_v8, %s71_s15 }
  0x7c   :  { %v11_v9 = vpop.permute.xlu0 %10  }
  0x7d   :  { %v23_v10 = vpop.permute.xlu1 %22   ;;  %51 = vst.msk [vmem:[%s118_s1 + $0x1] ss:$8 sm:$0xf] %vm7_vm0, %v11_v9  }
  0x7e   :  { %53 = vst.msk [vmem:[%s118_s1 + $0x3] ss:$8 sm:$0xf] %vm7_vm0, %v23_v10  }
  0x80   :  { %v17_v11 = vpop.permute.xlu0 %16  }
  0x81   :  { %v29_v12 = vpop.permute.xlu1 %28   ;;  %52 = vst.msk [vmem:[%s118_s1 + $0x2] ss:$8 sm:$0xf] %vm7_vm0, %v17_v11  }
  0x82   :  { %54 = vst.msk [vmem:[%s118_s1 + $0x4] ss:$8 sm:$0xf] %vm7_vm0, %v29_v12  }
  0x84   :  { %v35_v13 = vpop.permute.xlu0 %34  }
  0x85   :  { %v41_v14 = vpop.permute.xlu1 %40   ;;  %55 = vst.msk [vmem:[%s118_s1 + $0x5] ss:$8 sm:$0xf] %vm7_vm0, %v35_v13  }
  0x86   :  { %56 = vst.msk [vmem:[%s118_s1 + $0x6] ss:$8 sm:$0xf] %vm7_vm0, %v41_v14  }
  0x88   :  { %v47_v15 = vpop.permute.xlu0 %46  }
  0x89   :  { %57 = vst.msk [vmem:[%s118_s1 + $0x7] ss:$8 sm:$0xf] %vm7_vm0, %v47_v15  }

// kernel: model_forward.1
= control target key start
LH: loop header
LB: loop body
LE: loop exit
PB: predicated region body
PF: predicated region fallthrough
CT: control target
= control target key end

     0   :  { %s5207_s0 = inlined_call_operand.vmem [shape: bf16[32,1280], index: 0, kind: input, shape index: {}]   ;;  %s5208_s1 = inlined_call_operand.vmem [shape: bf16[1280,512], index: 1, kind: input, shape index: {}]   ;;  %s5209_s2 = inlined_call_operand.vmem [shape: f32[1,512], index: 2, kind: input, shape index: {}]   ;;  %s5210_s3 = inlined_call_operand.vmem [shape: f32[1,512], index: 3, kind: input, shape index: {}]   ;;  %s5211_s4 = inlined_call_operand.vmem [shape: bf16[32,32], index: 4, kind: input, shape index: {}]   ;;  %s5212_s5 = inlined_call_operand.vmem [shape: f32[32,1], index: 5, kind: input, shape index: {}]   ;;  %s5213_s6 = inlined_call_operand.hbm [shape: f32[32,512], index: 6, kind: output, shape index: {}]  }
   0x1   :  { %v3406_v0 = vld [vmem:[%s5208_s1 + $0x4] ss:$16 sps:$4 sm:$0xff]   ;;  %v3408_v1 = vld [vmem:[%s5208_s1 + $0xc] ss:$16 sps:$4 sm:$0xff]   ;;  %v3410_v2 = vld [vmem:[%s5208_s1] ss:$16 sps:$4 sm:$0xff]  }
   0x2   :  { %2065 = vmatprep.subr.bf16.mxu0 %v3406_v0  ;;  %v3411_v3 = vld [vmem:[%s5208_s1 + $0x8] ss:$16 sps:$4 sm:$0xff]   ;;  %2330 = vmatprep.subr.bf16.mxu1 %v3408_v1  ;;  %v3412_v4 = vld [vmem:[%s5208_s1 + $0x24] ss:$16 sps:$4 sm:$0xff]   ;;  %v3414_v5 = vld [vmem:[%s5208_s1 + $0x2c] ss:$16 sps:$4 sm:$0xff]  }
   0x3   :  { %2066 = vmatpush1.bf16.msra.mxu0 %v3410_v2  ;;  %2331 = vmatpush1.bf16.msra.mxu1 %v3411_v3  ;;  %v3416_v6 = vld [vmem:[%s5208_s1 + $0x20] ss:$16 sps:$4 sm:$0xff]   ;;  %v3417_v7 = vld [vmem:[%s5208_s1 + $0x28] ss:$16 sps:$4 sm:$0xff]   ;;  %v3418_v8 = vld [vmem:[%s5208_s1 + $0x44] ss:$16 sps:$4 sm:$0xff]  }
   0x4   :  { %2067 = vmatprep.subr.bf16.mxu0 %v3412_v4  ;;  %2332 = vmatprep.subr.bf16.mxu1 %v3414_v5  ;;  %v3420_v9 = vld [vmem:[%s5208_s1 + $0x4c] ss:$16 sps:$4 sm:$0xff]   ;;  %v3422_v10 = vld [vmem:[%s5208_s1 + $0x40] ss:$16 sps:$4 sm:$0xff]   ;;  %v3423_v11 = vld [vmem:[%s5208_s1 + $0x48] ss:$16 sps:$4 sm:$0xff]  }
   0x5   :  { %v3424_v12 = vld [vmem:[%s5208_s1 + $0x64] ss:$16 sps:$4 sm:$0xff]   ;;  %v3426_v13 = vld [vmem:[%s5208_s1 + $0x6c] ss:$16 sps:$4 sm:$0xff]   ;;  %v3428_v14 = vld [vmem:[%s5208_s1 + $0x60] ss:$16 sps:$4 sm:$0xff]  }
   0x6   :  { %v3429_v15 = vld [vmem:[%s5208_s1 + $0x68] ss:$16 sps:$4 sm:$0xff]   ;;  %v3430_v16 = vld [vmem:[%s5208_s1 + $0x84] ss:$16 sps:$4 sm:$0xff]   ;;  %v3432_v17 = vld [vmem:[%s5208_s1 + $0x8c] ss:$16 sps:$4 sm:$0xff]  }
   0x7   :  { %2068 = vmatpush1.bf16.msra.mxu0 %v3416_v6  ;;  %2333 = vmatpush1.bf16.msra.mxu1 %v3417_v7  ;;  %v3434_v18 = vld [vmem:[%s5208_s1 + $0x80] ss:$16 sps:$4 sm:$0xff]   ;;  %v3435_v19 = vld [vmem:[%s5208_s1 + $0x88] ss:$16 sps:$4 sm:$0xff]   ;;  %v3436_v20 = vld [vmem:[%s5208_s1 + $0xa4] ss:$16 sps:$4 sm:$0xff]  }
   0x8   :  { %2069 = vmatprep.subr.bf16.mxu0 %v3418_v8  ;;  %2334 = vmatprep.subr.bf16.mxu1 %v3420_v9  ;;  %v3438_v21 = vld [vmem:[%s5208_s1 + $0xac] ss:$16 sps:$4 sm:$0xff]   ;;  %v3440_v22 = vld [vmem:[%s5208_s1 + $0xa0] ss:$16 sps:$4 sm:$0xff]   ;;  %v3441_v23 = vld [vmem:[%s5208_s1 + $0xa8] ss:$16 sps:$4 sm:$0xff]  }
   0x9   :  { %v3442_v24 = vld [vmem:[%s5208_s1 + $0xc4] ss:$16 sps:$4 sm:$0xff]   ;;  %v3444_v25 = vld [vmem:[%s5208_s1 + $0xcc] ss:$16 sps:$4 sm:$0xff]   ;;  %v3446_v26 = vld [vmem:[%s5208_s1 + $0xc0] ss:$16 sps:$4 sm:$0xff]  }
   0xa   :  { %v3447_v27 = vld [vmem:[%s5208_s1 + $0xc8] ss:$16 sps:$4 sm:$0xff]   ;;  %v3448_v28 = vld [vmem:[%s5208_s1 + $0xe4] ss:$16 sps:$4 sm:$0xff]   ;;  %v3450_v29 = vld [vmem:[%s5208_s1 + $0xec] ss:$16 sps:$4 sm:$0xff]  }
   0xb   :  { %2070 = vmatpush1.bf16.msra.mxu0 %v3422_v10  ;;  %2335 = vmatpush1.bf16.msra.mxu1 %v3423_v11  ;;  %v3452_v30 = vld [vmem:[%s5208_s1 + $0xe0] ss:$16 sps:$4 sm:$0xff]   ;;  %v3453_v31 = vld [vmem:[%s5208_s1 + $0xe8] ss:$16 sps:$4 sm:$0xff]   ;;  %v3454_v32 = vld [vmem:[%s5208_s1 + $0x104] ss:$16 sps:$4 sm:$0xff]  }
   0xc   :  { %2071 = vmatprep.subr.bf16.mxu0 %v3424_v12  ;;  %2336 = vmatprep.subr.bf16.mxu1 %v3426_v13  ;;  %v3456_v33 = vld [vmem:[%s5208_s1 + $0x10c] ss:$16 sps:$4 sm:$0xff]   ;;  %v3458_v34 = vld [vmem:[%s5208_s1 + $0x100] ss:$16 sps:$4 sm:$0xff]   ;;  %v3459_v35 = vld [vmem:[%s5208_s1 + $0x108] ss:$16 sps:$4 sm:$0xff]  }
   0xd   :  { %v3460_v36 = vld [vmem:[%s5208_s1 + $0x124] ss:$16 sps:$4 sm:$0xff]   ;;  %v3462_v37 = vld [vmem:[%s5208_s1 + $0x12c] ss:$16 sps:$4 sm:$0xff]   ;;  %v3464_v38 = vld [vmem:[%s5208_s1 + $0x120] ss:$16 sps:$4 sm:$0xff]  }
   0xe   :  { %v3465_v39 = vld [vmem:[%s5208_s1 + $0x128] ss:$16 sps:$4 sm:$0xff]   ;;  %v3466_v40 = vld [vmem:[%s5208_s1 + $0x144] ss:$16 sps:$4 sm:$0xff]   ;;  %v3468_v41 = vld [vmem:[%s5208_s1 + $0x14c] ss:$16 sps:$4 sm:$0xff]  }
   0xf   :  { %2072 = vmatpush1.bf16.msra.mxu0 %v3428_v14  ;;  %2337 = vmatpush1.bf16.msra.mxu1 %v3429_v15  ;;  %v3470_v42 = vld [vmem:[%s5208_s1 + $0x140] ss:$16 sps:$4 sm:$0xff]   ;;  %v3471_v43 = vld [vmem:[%s5208_s1 + $0x148] ss:$16 sps:$4 sm:$0xff]   ;;  %v3472_v44 = vld [vmem:[%s5208_s1 + $0x164] ss:$16 sps:$4 sm:$0xff]  }
  0x10   :  { %2073 = vmatprep.subr.bf16.mxu0 %v3430_v16  ;;  %2338 = vmatprep.subr.bf16.mxu1 %v3432_v17  ;;  %v3474_v45 = vld [vmem:[%s5208_s1 + $0x16c] ss:$16 sps:$4 sm:$0xff]   ;;  %v3476_v46 = vld [vmem:[%s5208_s1 + $0x160] ss:$16 sps:$4 sm:$0xff]   ;;  %v3477_v47 = vld [vmem:[%s5208_s1 + $0x168] ss:$16 sps:$4 sm:$0xff]  }
  0x11   :  { %v3504_v48 = vld [vmem:[%s5207_s0 + $0x4] ss:$40 sps:$4 sm:$0xff]   ;;  %v3482_v51 = vld [vmem:[%s5208_s1 + $0x180] ss:$16 sps:$4 sm:$0xff]   ;;  %v3483_v52 = vld [vmem:[%s5208_s1 + $0x188] ss:$16 sps:$4 sm:$0xff]  }
  0x12   :  { %v3478_v49 = vld [vmem:[%s5208_s1 + $0x184] ss:$16 sps:$4 sm:$0xff]   ;;  %v3480_v50 = vld [vmem:[%s5208_s1 + $0x18c] ss:$16 sps:$4 sm:$0xff]   ;;  %2097 = vmatprep.mubr.bf16.mxu0 %v3504_v48  ;;  %2362 = vmatprep.mubr.bf16.mxu1 %v3504_v48  ;;  %v3488_v55 = vld [vmem:[%s5208_s1 + $0x1a0] ss:$16 sps:$4 sm:$0xff]  }
  0x13   :  { %2074 = vmatpush1.bf16.msra.mxu0 %v3434_v18  ;;  %2339 = vmatpush1.bf16.msra.mxu1 %v3435_v19  ;;  %v3484_v53 = vld [vmem:[%s5208_s1 + $0x1a4] ss:$16 sps:$4 sm:$0xff]   ;;  %v3486_v54 = vld [vmem:[%s5208_s1 + $0x1ac] ss:$16 sps:$4 sm:$0xff]   ;;  %v3489_v56 = vld [vmem:[%s5208_s1 + $0x1a8] ss:$16 sps:$4 sm:$0xff]  }
  0x14   :  { %2075 = vmatprep.subr.bf16.mxu0 %v3436_v20  ;;  %2340 = vmatprep.subr.bf16.mxu1 %v3438_v21  ;;  %v3490_v57 = vld [vmem:[%s5208_s1 + $0x1c4] ss:$16 sps:$4 sm:$0xff]   ;;  %v3492_v58 = vld [vmem:[%s5208_s1 + $0x1cc] ss:$16 sps:$4 sm:$0xff]   ;;  %v3494_v59 = vld [vmem:[%s5208_s1 + $0x1c0] ss:$16 sps:$4 sm:$0xff]  }
  0x15   :  { %v3495_v60 = vld [vmem:[%s5208_s1 + $0x1c8] ss:$16 sps:$4 sm:$0xff]   ;;  %v3496_v61 = vld [vmem:[%s5208_s1 + $0x1e4] ss:$16 sps:$4 sm:$0xff]   ;;  %v3498_v62 = vld [vmem:[%s5208_s1 + $0x1ec] ss:$16 sps:$4 sm:$0xff]  }
  0x16   :  { %v3500_v63 = vld [vmem:[%s5208_s1 + $0x1e0] ss:$16 sps:$4 sm:$0xff]   ;;  %v3501_v0 = vld [vmem:[%s5208_s1 + $0x1e8] ss:$16 sps:$4 sm:$0xff]   ;;  %v3507_v1 = vld [vmem:[%s5208_s1 + $0x204] ss:$16 sps:$4 sm:$0xff]  }
  0x17   :  { %2076 = vmatpush1.bf16.msra.mxu0 %v3440_v22  ;;  %2341 = vmatpush1.bf16.msra.mxu1 %v3441_v23  ;;  %v3510_v2 = vld [vmem:[%s5208_s1 + $0x20c] ss:$16 sps:$4 sm:$0xff]   ;;  %v3502_v3 = vld [vmem:[%s5207_s0] ss:$40 sps:$4 sm:$0xff]   ;;  %v3513_v6 = vld [vmem:[%s5208_s1 + $0x224] ss:$16 sps:$4 sm:$0xff]  }
  0x18   :  { %2077 = vmatprep.subr.bf16.mxu0 %v3442_v24  ;;  %2342 = vmatprep.subr.bf16.mxu1 %v3444_v25  ;;  %v3505_v4 = vld [vmem:[%s5208_s1 + $0x200] ss:$16 sps:$4 sm:$0xff]   ;;  %v3508_v5 = vld [vmem:[%s5208_s1 + $0x208] ss:$16 sps:$4 sm:$0xff]   ;;  %v3516_v7 = vld [vmem:[%s5208_s1 + $0x22c] ss:$16 sps:$4 sm:$0xff]  }
  0x19   :  { %v3511_v8 = vld [vmem:[%s5208_s1 + $0x220] ss:$16 sps:$4 sm:$0xff]   ;;  %v3514_v9 = vld [vmem:[%s5208_s1 + $0x228] ss:$16 sps:$4 sm:$0xff]   ;;  %v3519_v10 = vld [vmem:[%s5208_s1 + $0x244] ss:$16 sps:$4 sm:$0xff]  }
  0x1a   :  { %v3522_v11 = vld [vmem:[%s5208_s1 + $0x24c] ss:$16 sps:$4 sm:$0xff]   ;;  %v3517_v12 = vld [vmem:[%s5208_s1 + $0x240] ss:$16 sps:$4 sm:$0xff]   ;;  %v3520_v13 = vld [vmem:[%s5208_s1 + $0x248] ss:$16 sps:$4 sm:$0xff]  }
  0x1b   :  { %2078 = vmatpush1.bf16.msra.mxu0 %v3446_v26  ;;  %2343 = vmatpush1.bf16.msra.mxu1 %v3447_v27  ;;  %v3525_v14 = vld [vmem:[%s5208_s1 + $0x264] ss:$16 sps:$4 sm:$0xff]   ;;  %v3528_v15 = vld [vmem:[%s5208_s1 + $0x26c] ss:$16 sps:$4 sm:$0xff]   ;;  %v3523_v16 = vld [vmem:[%s5208_s1 + $0x260] ss:$16 sps:$4 sm:$0xff]  }
  0x1c   :  { %2079 = vmatprep.subr.bf16.mxu0 %v3448_v28  ;;  %2344 = vmatprep.subr.bf16.mxu1 %v3450_v29  ;;  %v3526_v17 = vld [vmem:[%s5208_s1 + $0x268] ss:$16 sps:$4 sm:$0xff]   ;;  %v3531_v18 = vld [vmem:[%s5208_s1 + $0x284] ss:$16 sps:$4 sm:$0xff]   ;;  %v3534_v19 = vld [vmem:[%s5208_s1 + $0x28c] ss:$16 sps:$4 sm:$0xff]  }
  0x1d   :  { %v3529_v20 = vld [vmem:[%s5208_s1 + $0x280] ss:$16 sps:$4 sm:$0xff]   ;;  %v3532_v21 = vld [vmem:[%s5208_s1 + $0x288] ss:$16 sps:$4 sm:$0xff]   ;;  %v3537_v22 = vld [vmem:[%s5208_s1 + $0x2a4] ss:$16 sps:$4 sm:$0xff]  }
  0x1e   :  { %v3540_v23 = vld [vmem:[%s5208_s1 + $0x2ac] ss:$16 sps:$4 sm:$0xff]   ;;  %v3535_v25 = vld [vmem:[%s5208_s1 + $0x2a0] ss:$16 sps:$4 sm:$0xff]   ;;  %v3538_v26 = vld [vmem:[%s5208_s1 + $0x2a8] ss:$16 sps:$4 sm:$0xff]  }
  0x1f   :  { %2080 = vmatpush1.bf16.msra.mxu0 %v3452_v30  ;;  %2345 = vmatpush1.bf16.msra.mxu1 %v3453_v31  ;;  %v3589_v24 = vld [vmem:[%s5207_s0 + $0x54] ss:$40 sps:$4 sm:$0xff]   ;;  %v3597_v29 = vld [vmem:[%s5207_s0 + $0x50] ss:$40 sps:$4 sm:$0xff]  }
  0x20   :  { %2081 = vmatprep.subr.bf16.mxu0 %v3454_v32  ;;  %2346 = vmatprep.subr.bf16.mxu1 %v3456_v33  ;;  %v3543_v27 = vld [vmem:[%s5208_s1 + $0x2c4] ss:$16 sps:$4 sm:$0xff]   ;;  %v3546_v28 = vld [vmem:[%s5208_s1 + $0x2cc] ss:$16 sps:$4 sm:$0xff]   ;;  %v3541_v30 = vld [vmem:[%s5208_s1 + $0x2c0] ss:$16 sps:$4 sm:$0xff]  }
  0x21   :  { %v3544_v31 = vld [vmem:[%s5208_s1 + $0x2c8] ss:$16 sps:$4 sm:$0xff]   ;;  %v3549_v32 = vld [vmem:[%s5208_s1 + $0x2e4] ss:$16 sps:$4 sm:$0xff]   ;;  %v3552_v33 = vld [vmem:[%s5208_s1 + $0x2ec] ss:$16 sps:$4 sm:$0xff]  }
  0x22   :  { %v3568_v48 = vld [vmem:[%s5208_s1 + $0x348] ss:$16 sps:$4 sm:$0xff]  }
  0x23   :  { %2082 = vmatpush1.bf16.msra.mxu0 %v3458_v34  ;;  %2347 = vmatpush1.bf16.msra.mxu1 %v3459_v35  ;;  %v3606_v34 = vld [vmem:[%s5207_s0 + $0xc] ss:$40 sps:$4 sm:$0xff]   ;;  %v3547_v35 = vld [vmem:[%s5208_s1 + $0x2e0] ss:$16 sps:$4 sm:$0xff]  }
  0x24   :  { %2083 = vmatprep.subr.bf16.mxu0 %v3460_v36  ;;  %2348 = vmatprep.subr.bf16.mxu1 %v3462_v37  ;;  %v3550_v36 = vld [vmem:[%s5208_s1 + $0x2e8] ss:$16 sps:$4 sm:$0xff]   ;;  %v3555_v37 = vld [vmem:[%s5208_s1 + $0x304] ss:$16 sps:$4 sm:$0xff]  }
  0x27   :  { %2084 = vmatpush1.bf16.msra.mxu0 %v3464_v38  ;;  %2349 = vmatpush1.bf16.msra.mxu1 %v3465_v39  ;;  %v3558_v38 = vld [vmem:[%s5208_s1 + $0x30c] ss:$16 sps:$4 sm:$0xff]   ;;  %v3553_v39 = vld [vmem:[%s5208_s1 + $0x300] ss:$16 sps:$4 sm:$0xff]  }
  0x28   :  { %2085 = vmatprep.subr.bf16.mxu0 %v3466_v40  ;;  %2350 = vmatprep.subr.bf16.mxu1 %v3468_v41  ;;  %v3556_v40 = vld [vmem:[%s5208_s1 + $0x308] ss:$16 sps:$4 sm:$0xff]   ;;  %v3561_v41 = vld [vmem:[%s5208_s1 + $0x324] ss:$16 sps:$4 sm:$0xff]  }
  0x2b   :  { %2086 = vmatpush1.bf16.msra.mxu0 %v3470_v42  ;;  %2351 = vmatpush1.bf16.msra.mxu1 %v3471_v43  ;;  %v3564_v42 = vld [vmem:[%s5208_s1 + $0x32c] ss:$16 sps:$4 sm:$0xff]   ;;  %v3559_v43 = vld [vmem:[%s5208_s1 + $0x320] ss:$16 sps:$4 sm:$0xff]  }
  0x2c   :  { %2087 = vmatprep.subr.bf16.mxu0 %v3472_v44  ;;  %2352 = vmatprep.subr.bf16.mxu1 %v3474_v45  ;;  %v3562_v44 = vld [vmem:[%s5208_s1 + $0x328] ss:$16 sps:$4 sm:$0xff]   ;;  %v3567_v45 = vld [vmem:[%s5208_s1 + $0x344] ss:$16 sps:$4 sm:$0xff]  }
  0x2f   :  { %2088 = vmatpush1.bf16.msra.mxu0 %v3476_v46  ;;  %2353 = vmatpush1.bf16.msra.mxu1 %v3477_v47  ;;  %v3570_v46 = vld [vmem:[%s5208_s1 + $0x34c] ss:$16 sps:$4 sm:$0xff]   ;;  %v3565_v47 = vld [vmem:[%s5208_s1 + $0x340] ss:$16 sps:$4 sm:$0xff]  }
  0x30   :  { %2089 = vmatprep.subr.bf16.mxu0 %v3478_v49  ;;  %2354 = vmatprep.subr.bf16.mxu1 %v3480_v50  ;;  %v3573_v49 = vld [vmem:[%s5208_s1 + $0x364] ss:$16 sps:$4 sm:$0xff]   ;;  %v3576_v50 = vld [vmem:[%s5208_s1 + $0x36c] ss:$16 sps:$4 sm:$0xff]  }
  0x33   :  { %2090 = vmatpush1.bf16.msra.mxu0 %v3482_v51  ;;  %2355 = vmatpush1.bf16.msra.mxu1 %v3483_v52  ;;  %v3571_v51 = vld [vmem:[%s5208_s1 + $0x360] ss:$16 sps:$4 sm:$0xff]   ;;  %v3574_v52 = vld [vmem:[%s5208_s1 + $0x368] ss:$16 sps:$4 sm:$0xff]  }
  0x34   :  { %2091 = vmatprep.subr.bf16.mxu0 %v3484_v53  ;;  %2356 = vmatprep.subr.bf16.mxu1 %v3486_v54  ;;  %v3579_v53 = vld [vmem:[%s5208_s1 + $0x384] ss:$16 sps:$4 sm:$0xff]   ;;  %v3582_v54 = vld [vmem:[%s5208_s1 + $0x38c] ss:$16 sps:$4 sm:$0xff]  }
  0x37   :  { %2092 = vmatpush1.bf16.msra.mxu0 %v3488_v55  ;;  %2357 = vmatpush1.bf16.msra.mxu1 %v3489_v56  ;;  %v3577_v55 = vld [vmem:[%s5208_s1 + $0x380] ss:$16 sps:$4 sm:$0xff]   ;;  %v3580_v56 = vld [vmem:[%s5208_s1 + $0x388] ss:$16 sps:$4 sm:$0xff]  }
  0x38   :  { %2093 = vmatprep.subr.bf16.mxu0 %v3490_v57  ;;  %2358 = vmatprep.subr.bf16.mxu1 %v3492_v58  ;;  %v3585_v57 = vld [vmem:[%s5208_s1 + $0x3a4] ss:$16 sps:$4 sm:$0xff]   ;;  %v3588_v58 = vld [vmem:[%s5208_s1 + $0x3ac] ss:$16 sps:$4 sm:$0xff]  }
  0x3b   :  { %2094 = vmatpush1.bf16.msra.mxu0 %v3494_v59  ;;  %2359 = vmatpush1.bf16.msra.mxu1 %v3495_v60  ;;  %v3583_v59 = vld [vmem:[%s5208_s1 + $0x3a0] ss:$16 sps:$4 sm:$0xff]   ;;  %v3586_v60 = vld [vmem:[%s5208_s1 + $0x3a8] ss:$16 sps:$4 sm:$0xff]  }
  0x3c   :  { %2095 = vmatprep.subr.bf16.mxu0 %v3496_v61  ;;  %2360 = vmatprep.subr.bf16.mxu1 %v3498_v62  ;;  %v3593_v61 = vld [vmem:[%s5208_s1 + $0x3c4] ss:$16 sps:$4 sm:$0xff]   ;;  %v3596_v62 = vld [vmem:[%s5208_s1 + $0x3cc] ss:$16 sps:$4 sm:$0xff]  }
  0x3f   :  { %2096 = vmatpush1.bf16.msra.mxu0 %v3500_v63  ;;  %2361 = vmatpush1.bf16.msra.mxu1 %v3501_v0  ;;  %v3591_v63 = vld [vmem:[%s5208_s1 + $0x3c0] ss:$16 sps:$4 sm:$0xff]   ;;  %v3594_v0 = vld [vmem:[%s5208_s1 + $0x3c8] ss:$16 sps:$4 sm:$0xff]  }
  0x40   :  { %2118 = vmatprep.subr.bf16.mxu0 %v3507_v1  ;;  %2383 = vmatprep.subr.bf16.mxu1 %v3510_v2  ;;  %v3600_v1 = vld [vmem:[%s5208_s1 + $0x3e4] ss:$16 sps:$4 sm:$0xff]   ;;  %v3603_v2 = vld [vmem:[%s5208_s1 + $0x3ec] ss:$16 sps:$4 sm:$0xff]  }
  0x42   :  { %2098 = vmatmul.mubr.bf16.vlgmr.msra.gmra.mrb[0].mxu0 %v3502_v3  ;;  %2363 = vmatmul.mubr.bf16.vlgmr.msra.gmra.mrb[0].mxu1 %v3502_v3  ;;  %v3598_v3 = vld [vmem:[%s5208_s1 + $0x3e0] ss:$16 sps:$4 sm:$0xff]  }
  0x43   :  { %2119 = vmatpush1.bf16.msra.mxu0 %v3505_v4  ;;  %2384 = vmatpush1.bf16.msra.mxu1 %v3508_v5  ;;  %v3601_v4 = vld [vmem:[%s5208_s1 + $0x3e8] ss:$16 sps:$4 sm:$0xff]   ;;  %v3609_v5 = vld [vmem:[%s5208_s1 + $0x404] ss:$16 sps:$4 sm:$0xff]  }
  0x44   :  { %2120 = vmatprep.subr.bf16.mxu0 %v3513_v6  ;;  %2385 = vmatprep.subr.bf16.mxu1 %v3516_v7  ;;  %v3612_v6 = vld [vmem:[%s5208_s1 + $0x40c] ss:$16 sps:$4 sm:$0xff]   ;;  %v3604_v7 = vld [vmem:[%s5207_s0 + $0x8] ss:$40 sps:$4 sm:$0xff]  }
  0x45   :  { %2107 = vmatprep.mubr.bf16.mxu0 %v3589_v24  ;;  %2372 = vmatprep.mubr.bf16.mxu1 %v3589_v24  ;;  %v3628_v24 = vld [vmem:[%s5208_s1 + $0x468] ss:$16 sps:$4 sm:$0xff]  }
  0x47   :  { %2121 = vmatpush1.bf16.msra.mxu0 %v3511_v8  ;;  %2386 = vmatpush1.bf16.msra.mxu1 %v3514_v9  ;;  %v3607_v8 = vld [vmem:[%s5208_s1 + $0x400] ss:$16 sps:$4 sm:$0xff]   ;;  %v3610_v9 = vld [vmem:[%s5208_s1 + $0x408] ss:$16 sps:$4 sm:$0xff]  }
  0x48   :  { %2122 = vmatprep.subr.bf16.mxu0 %v3519_v10  ;;  %2387 = vmatprep.subr.bf16.mxu1 %v3522_v11  ;;  %v3615_v10 = vld [vmem:[%s5208_s1 + $0x424] ss:$16 sps:$4 sm:$0xff]   ;;  %v3618_v11 = vld [vmem:[%s5208_s1 + $0x42c] ss:$16 sps:$4 sm:$0xff]  }
  0x4a   :  { %2108 = vmatmul.mubr.bf16.gmra.mrb[4].mxu0 %v3597_v29  ;;  %2373 = vmatmul.mubr.bf16.gmra.mrb[4].mxu1 %v3597_v29  ;;  %v3639_v29 = vld [vmem:[%s5208_s1 + $0x4a4] ss:$16 sps:$4 sm:$0xff]  }
  0x4b   :  { %2123 = vmatpush1.bf16.msra.mxu0 %v3517_v12  ;;  %2388 = vmatpush1.bf16.msra.mxu1 %v3520_v13  ;;  %v3691_v12 = vld [vmem:[%s5207_s0 + $0x5c] ss:$40 sps:$4 sm:$0xff]   ;;  %v3613_v13 = vld [vmem:[%s5208_s1 + $0x420] ss:$16 sps:$4 sm:$0xff]  }
  0x4c   :  { %2124 = vmatprep.subr.bf16.mxu0 %v3525_v14  ;;  %2389 = vmatprep.subr.bf16.mxu1 %v3528_v15  ;;  %v3616_v14 = vld [vmem:[%s5208_s1 + $0x428] ss:$16 sps:$4 sm:$0xff]   ;;  %v3621_v15 = vld [vmem:[%s5208_s1 + $0x444] ss:$16 sps:$4 sm:$0xff]  }
  0x4d   :  { %2150 = vmatprep.mubr.bf16.mxu0 %v3606_v34  ;;  %2415 = vmatprep.mubr.bf16.mxu1 %v3606_v34  ;;  %v3648_v34 = vld [vmem:[%s5208_s1 + $0x4cc] ss:$16 sps:$4 sm:$0xff]  }
  0x4f   :  { %2125 = vmatpush1.bf16.msra.mxu0 %v3523_v16  ;;  %2390 = vmatpush1.bf16.msra.mxu1 %v3526_v17  ;;  %v3624_v16 = vld [vmem:[%s5208_s1 + $0x44c] ss:$16 sps:$4 sm:$0xff]   ;;  %v3619_v17 = vld [vmem:[%s5208_s1 + $0x440] ss:$16 sps:$4 sm:$0xff]  }
  0x50   :  { %2126 = vmatprep.subr.bf16.mxu0 %v3531_v18  ;;  %2391 = vmatprep.subr.bf16.mxu1 %v3534_v19  ;;  %v3622_v18 = vld [vmem:[%s5208_s1 + $0x448] ss:$16 sps:$4 sm:$0xff]  }
  0x51   :  { %v3699_v19 = vld [vmem:[%s5207_s0 + $0x58] ss:$40 sps:$4 sm:$0xff]  }
  0x53   :  { %2127 = vmatpush1.bf16.msra.mxu0 %v3529_v20  ;;  %2392 = vmatpush1.bf16.msra.mxu1 %v3532_v21  ;;  %v3627_v20 = vld [vmem:[%s5208_s1 + $0x464] ss:$16 sps:$4 sm:$0xff]   ;;  %v3630_v21 = vld [vmem:[%s5208_s1 + $0x46c] ss:$16 sps:$4 sm:$0xff]  }
  0x54   :  { %2128 = vmatprep.subr.bf16.mxu0 %v3537_v22  ;;  %2393 = vmatprep.subr.bf16.mxu1 %v3540_v23  ;;  %v3708_v22 = vld [vmem:[%s5207_s0 + $0x14] ss:$40 sps:$4 sm:$0xff]   ;;  %v3625_v23 = vld [vmem:[%s5208_s1 + $0x460] ss:$16 sps:$4 sm:$0xff]  }
  0x57   :  { %2129 = vmatpush1.bf16.msra.mxu0 %v3535_v25  ;;  %2394 = vmatpush1.bf16.msra.mxu1 %v3538_v26  ;;  %v3633_v25 = vld [vmem:[%s5208_s1 + $0x484] ss:$16 sps:$4 sm:$0xff]   ;;  %v3636_v26 = vld [vmem:[%s5208_s1 + $0x48c] ss:$16 sps:$4 sm:$0xff]  }
  0x58   :  { %2130 = vmatprep.subr.bf16.mxu0 %v3543_v27  ;;  %2395 = vmatprep.subr.bf16.mxu1 %v3546_v28  ;;  %v3631_v27 = vld [vmem:[%s5208_s1 + $0x480] ss:$16 sps:$4 sm:$0xff]   ;;  %v3634_v28 = vld [vmem:[%s5208_s1 + $0x488] ss:$16 sps:$4 sm:$0xff]  }
  0x5b   :  { %2131 = vmatpush1.bf16.msra.mxu0 %v3541_v30  ;;  %2396 = vmatpush1.bf16.msra.mxu1 %v3544_v31  ;;  %v3642_v30 = vld [vmem:[%s5208_s1 + $0x4ac] ss:$16 sps:$4 sm:$0xff]   ;;  %v3637_v31 = vld [vmem:[%s5208_s1 + $0x4a0] ss:$16 sps:$4 sm:$0xff]  }
  0x5c   :  { %2132 = vmatprep.subr.bf16.mxu0 %v3549_v32  ;;  %2397 = vmatprep.subr.bf16.mxu1 %v3552_v33  ;;  %v3640_v32 = vld [vmem:[%s5208_s1 + $0x4a8] ss:$16 sps:$4 sm:$0xff]   ;;  %v3645_v33 = vld [vmem:[%s5208_s1 + $0x4c4] ss:$16 sps:$4 sm:$0xff]  }
  0x5f   :  { %2133 = vmatpush1.bf16.msra.mxu0 %v3547_v35  ;;  %2398 = vmatpush1.bf16.msra.mxu1 %v3550_v36  ;;  %v3643_v35 = vld [vmem:[%s5208_s1 + $0x4c0] ss:$16 sps:$4 sm:$0xff]   ;;  %v3646_v36 = vld [vmem:[%s5208_s1 + $0x4c8] ss:$16 sps:$4 sm:$0xff]  }
  0x60   :  { %2134 = vmatprep.subr.bf16.mxu0 %v3555_v37  ;;  %2399 = vmatprep.subr.bf16.mxu1 %v3558_v38  ;;  %v3651_v37 = vld [vmem:[%s5208_s1 + $0x4e4] ss:$16 sps:$4 sm:$0xff]   ;;  %v3654_v38 = vld [vmem:[%s5208_s1 + $0x4ec] ss:$16 sps:$4 sm:$0xff]  }
  0x63   :  { %2135 = vmatpush1.bf16.msra.mxu0 %v3553_v39  ;;  %2400 = vmatpush1.bf16.msra.mxu1 %v3556_v40  ;;  %v3649_v39 = vld [vmem:[%s5208_s1 + $0x4e0] ss:$16 sps:$4 sm:$0xff]   ;;  %v3652_v40 = vld [vmem:[%s5208_s1 + $0x4e8] ss:$16 sps:$4 sm:$0xff]  }
  0x64   :  { %2136 = vmatprep.subr.bf16.mxu0 %v3561_v41  ;;  %2401 = vmatprep.subr.bf16.mxu1 %v3564_v42  ;;  %v3657_v41 = vld [vmem:[%s5208_s1 + $0x504] ss:$16 sps:$4 sm:$0xff]   ;;  %v3660_v42 = vld [vmem:[%s5208_s1 + $0x50c] ss:$16 sps:$4 sm:$0xff]  }
  0x67   :  { %2137 = vmatpush1.bf16.msra.mxu0 %v3559_v43  ;;  %2402 = vmatpush1.bf16.msra.mxu1 %v3562_v44  ;;  %v3655_v43 = vld [vmem:[%s5208_s1 + $0x500] ss:$16 sps:$4 sm:$0xff]   ;;  %v3658_v44 = vld [vmem:[%s5208_s1 + $0x508] ss:$16 sps:$4 sm:$0xff]  }
  0x68   :  { %2138 = vmatprep.subr.bf16.mxu0 %v3567_v45  ;;  %2403 = vmatprep.subr.bf16.mxu1 %v3570_v46  ;;  %v3663_v45 = vld [vmem:[%s5208_s1 + $0x524] ss:$16 sps:$4 sm:$0xff]   ;;  %v3666_v46 = vld [vmem:[%s5208_s1 + $0x52c] ss:$16 sps:$4 sm:$0xff]  }
  0x6b   :  { %2139 = vmatpush1.bf16.msra.mxu0 %v3565_v47  ;;  %2404 = vmatpush1.bf16.msra.mxu1 %v3568_v48  ;;  %v3661_v47 = vld [vmem:[%s5208_s1 + $0x520] ss:$16 sps:$4 sm:$0xff]   ;;  %v3664_v48 = vld [vmem:[%s5208_s1 + $0x528] ss:$16 sps:$4 sm:$0xff]  }
  0x6c   :  { %2140 = vmatprep.subr.bf16.mxu0 %v3573_v49  ;;  %2405 = vmatprep.subr.bf16.mxu1 %v3576_v50  ;;  %v3669_v49 = vld [vmem:[%s5208_s1 + $0x544] ss:$16 sps:$4 sm:$0xff]   ;;  %v3672_v50 = vld [vmem:[%s5208_s1 + $0x54c] ss:$16 sps:$4 sm:$0xff]  }
  0x6f   :  { %2141 = vmatpush1.bf16.msra.mxu0 %v3571_v51  ;;  %2406 = vmatpush1.bf16.msra.mxu1 %v3574_v52  ;;  %v3667_v51 = vld [vmem:[%s5208_s1 + $0x540] ss:$16 sps:$4 sm:$0xff]   ;;  %v3670_v52 = vld [vmem:[%s5208_s1 + $0x548] ss:$16 sps:$4 sm:$0xff]  }
  0x70   :  { %2142 = vmatprep.subr.bf16.mxu0 %v3579_v53  ;;  %2407 = vmatprep.subr.bf16.mxu1 %v3582_v54  ;;  %v3675_v53 = vld [vmem:[%s5208_s1 + $0x564] ss:$16 sps:$4 sm:$0xff]   ;;  %v3678_v54 = vld [vmem:[%s5208_s1 + $0x56c] ss:$16 sps:$4 sm:$0xff]  }
  0x73   :  { %2143 = vmatpush1.bf16.msra.mxu0 %v3577_v55  ;;  %2408 = vmatpush1.bf16.msra.mxu1 %v3580_v56  ;;  %v3673_v55 = vld [vmem:[%s5208_s1 + $0x560] ss:$16 sps:$4 sm:$0xff]   ;;  %v3676_v56 = vld [vmem:[%s5208_s1 + $0x568] ss:$16 sps:$4 sm:$0xff]  }
  0x74   :  { %2144 = vmatprep.subr.bf16.mxu0 %v3585_v57  ;;  %2409 = vmatprep.subr.bf16.mxu1 %v3588_v58  ;;  %v3681_v57 = vld [vmem:[%s5208_s1 + $0x584] ss:$16 sps:$4 sm:$0xff]   ;;  %v3684_v58 = vld [vmem:[%s5208_s1 + $0x58c] ss:$16 sps:$4 sm:$0xff]  }
  0x77   :  { %2145 = vmatpush1.bf16.msra.mxu0 %v3583_v59  ;;  %2410 = vmatpush1.bf16.msra.mxu1 %v3586_v60  ;;  %v3679_v59 = vld [vmem:[%s5208_s1 + $0x580] ss:$16 sps:$4 sm:$0xff]   ;;  %v3682_v60 = vld [vmem:[%s5208_s1 + $0x588] ss:$16 sps:$4 sm:$0xff]  }
  0x78   :  { %2146 = vmatprep.subr.bf16.mxu0 %v3593_v61  ;;  %2411 = vmatprep.subr.bf16.mxu1 %v3596_v62  ;;  %v3687_v61 = vld [vmem:[%s5208_s1 + $0x5a4] ss:$16 sps:$4 sm:$0xff]   ;;  %v3690_v62 = vld [vmem:[%s5208_s1 + $0x5ac] ss:$16 sps:$4 sm:$0xff]  }
  0x7b   :  { %2147 = vmatpush1.bf16.msra.mxu0 %v3591_v63  ;;  %2412 = vmatpush1.bf16.msra.mxu1 %v3594_v0  ;;  %v3685_v63 = vld [vmem:[%s5208_s1 + $0x5a0] ss:$16 sps:$4 sm:$0xff]   ;;  %v3688_v0 = vld [vmem:[%s5208_s1 + $0x5a8] ss:$16 sps:$4 sm:$0xff]  }
  0x7c   :  { %2148 = vmatprep.subr.bf16.mxu0 %v3600_v1  ;;  %2413 = vmatprep.subr.bf16.mxu1 %v3603_v2  ;;  %v3695_v1 = vld [vmem:[%s5208_s1 + $0x5c4] ss:$16 sps:$4 sm:$0xff]   ;;  %v3698_v2 = vld [vmem:[%s5208_s1 + $0x5cc] ss:$16 sps:$4 sm:$0xff]  }
  0x7f   :  { %2149 = vmatpush1.bf16.msra.mxu0 %v3598_v3  ;;  %2414 = vmatpush1.bf16.msra.mxu1 %v3601_v4  ;;  %v3693_v3 = vld [vmem:[%s5208_s1 + $0x5c0] ss:$16 sps:$4 sm:$0xff]   ;;  %v3696_v4 = vld [vmem:[%s5208_s1 + $0x5c8] ss:$16 sps:$4 sm:$0xff]  }
  0x80   :  { %2171 = vmatprep.subr.bf16.mxu0 %v3609_v5  ;;  %2436 = vmatprep.subr.bf16.mxu1 %v3612_v6  ;;  %v3702_v5 = vld [vmem:[%s5208_s1 + $0x5e4] ss:$16 sps:$4 sm:$0xff]   ;;  %v3705_v6 = vld [vmem:[%s5208_s1 + $0x5ec] ss:$16 sps:$4 sm:$0xff]  }
  0x82   :  { %2151 = vmatmul.mubr.bf16.vlgmr.msra.gmra.mrb[0].mxu0 %v3604_v7  ;;  %2416 = vmatmul.mubr.bf16.vlgmr.msra.gmra.mrb[0].mxu1 %v3604_v7  ;;  %v3700_v7 = vld [vmem:[%s5208_s1 + $0x5e0] ss:$16 sps:$4 sm:$0xff]  }
  0x83   :  { %2172 = vmatpush1.bf16.msra.mxu0 %v3607_v8  ;;  %2437 = vmatpush1.bf16.msra.mxu1 %v3610_v9  ;;  %v3703_v8 = vld [vmem:[%s5208_s1 + $0x5e8] ss:$16 sps:$4 sm:$0xff]   ;;  %v3711_v9 = vld [vmem:[%s5208_s1 + $0x604] ss:$16 sps:$4 sm:$0xff]  }
  0x84   :  { %2173 = vmatprep.subr.bf16.mxu0 %v3615_v10  ;;  %2438 = vmatprep.subr.bf16.mxu1 %v3618_v11  ;;  %v3714_v10 = vld [vmem:[%s5208_s1 + $0x60c] ss:$16 sps:$4 sm:$0xff]   ;;  %v3706_v11 = vld [vmem:[%s5207_s0 + $0x10] ss:$40 sps:$4 sm:$0xff]  }
  0x85   :  { %2160 = vmatprep.mubr.bf16.mxu0 %v3691_v12  ;;  %2425 = vmatprep.mubr.bf16.mxu1 %v3691_v12  ;;  %v3709_v12 = vld [vmem:[%s5208_s1 + $0x600] ss:$16 sps:$4 sm:$0xff]  }
  0x87   :  { %2174 = vmatpush1.bf16.msra.mxu0 %v3613_v13  ;;  %2439 = vmatpush1.bf16.msra.mxu1 %v3616_v14  ;;  %v3712_v13 = vld [vmem:[%s5208_s1 + $0x608] ss:$16 sps:$4 sm:$0xff]   ;;  %v3717_v14 = vld [vmem:[%s5208_s1 + $0x624] ss:$16 sps:$4 sm:$0xff]  }
  0x88   :  { %2175 = vmatprep.subr.bf16.mxu0 %v3621_v15  ;;  %2440 = vmatprep.subr.bf16.mxu1 %v3624_v16  ;;  %v3720_v15 = vld [vmem:[%s5208_s1 + $0x62c] ss:$16 sps:$4 sm:$0xff]  }
  0x89   :  { %v3793_v16 = vld [vmem:[%s5207_s0 + $0x64] ss:$40 sps:$4 sm:$0xff]  }
  0x8a   :  { %2161 = vmatmul.mubr.bf16.gmra.mrb[4].mxu0 %v3699_v19  ;;  %2426 = vmatmul.mubr.bf16.gmra.mrb[4].mxu1 %v3699_v19  ;;  %v3723_v19 = vld [vmem:[%s5208_s1 + $0x644] ss:$16 sps:$4 sm:$0xff]  }
  0x8b   :  { %2176 = vmatpush1.bf16.msra.mxu0 %v3619_v17  ;;  %2441 = vmatpush1.bf16.msra.mxu1 %v3622_v18  ;;  %v3715_v17 = vld [vmem:[%s5208_s1 + $0x620] ss:$16 sps:$4 sm:$0xff]   ;;  %v3718_v18 = vld [vmem:[%s5208_s1 + $0x628] ss:$16 sps:$4 sm:$0xff]  }
  0x8c   :  { %2177 = vmatprep.subr.bf16.mxu0 %v3627_v20  ;;  %2442 = vmatprep.subr.bf16.mxu1 %v3630_v21  ;;  %v3726_v20 = vld [vmem:[%s5208_s1 + $0x64c] ss:$16 sps:$4 sm:$0xff]   ;;  %v3721_v21 = vld [vmem:[%s5208_s1 + $0x640] ss:$16 sps:$4 sm:$0xff]  }
  0x8d   :  { %2203 = vmatprep.mubr.bf16.mxu0 %v3708_v22  ;;  %2468 = vmatprep.mubr.bf16.mxu1 %v3708_v22  ;;  %v3724_v22 = vld [vmem:[%s5208_s1 + $0x648] ss:$16 sps:$4 sm:$0xff]  }
  0x8f   :  { %2178 = vmatpush1.bf16.msra.mxu0 %v3625_v23  ;;  %2443 = vmatpush1.bf16.msra.mxu1 %v3628_v24  ;;  %v3801_v23 = vld [vmem:[%s5207_s0 + $0x60] ss:$40 sps:$4 sm:$0xff]   ;;  %v3729_v24 = vld [vmem:[%s5208_s1 + $0x664] ss:$16 sps:$4 sm:$0xff]  }
  0x90   :  { %2179 = vmatprep.subr.bf16.mxu0 %v3633_v25  ;;  %2444 = vmatprep.subr.bf16.mxu1 %v3636_v26  ;;  %v3732_v25 = vld [vmem:[%s5208_s1 + $0x66c] ss:$16 sps:$4 sm:$0xff]  }
  0x91   :  { %v3810_v26 = vld [vmem:[%s5207_s0 + $0x1c] ss:$40 sps:$4 sm:$0xff]  }
  0x93   :  { %2180 = vmatpush1.bf16.msra.mxu0 %v3631_v27  ;;  %2445 = vmatpush1.bf16.msra.mxu1 %v3634_v28  ;;  %v3727_v27 = vld [vmem:[%s5208_s1 + $0x660] ss:$16 sps:$4 sm:$0xff]   ;;  %v3730_v28 = vld [vmem:[%s5208_s1 + $0x668] ss:$16 sps:$4 sm:$0xff]  }
  0x94   :  { %2181 = vmatprep.subr.bf16.mxu0 %v3639_v29  ;;  %2446 = vmatprep.subr.bf16.mxu1 %v3642_v30  ;;  %v3735_v29 = vld [vmem:[%s5208_s1 + $0x684] ss:$16 sps:$4 sm:$0xff]   ;;  %v3738_v30 = vld [vmem:[%s5208_s1 + $0x68c] ss:$16 sps:$4 sm:$0xff]  }
  0x97   :  { %2182 = vmatpush1.bf16.msra.mxu0 %v3637_v31  ;;  %2447 = vmatpush1.bf16.msra.mxu1 %v3640_v32  ;;  %v3733_v31 = vld [vmem:[%s5208_s1 + $0x680] ss:$16 sps:$4 sm:$0xff]   ;;  %v3736_v32 = vld [vmem:[%s5208_s1 + $0x688] ss:$16 sps:$4 sm:$0xff]  }
  0x98   :  { %2183 = vmatprep.subr.bf16.mxu0 %v3645_v33  ;;  %2448 = vmatprep.subr.bf16.mxu1 %v3648_v34  ;;  %v3741_v33 = vld [vmem:[%s5208_s1 + $0x6a4] ss:$16 sps:$4 sm:$0xff]   ;;  %v3744_v34 = vld [vmem:[%s5208_s1 + $0x6ac] ss:$16 sps:$4 sm:$0xff]  }
  0x9b   :  { %2184 = vmatpush1.bf16.msra.mxu0 %v3643_v35  ;;  %2449 = vmatpush1.bf16.msra.mxu1 %v3646_v36  ;;  %v3739_v35 = vld [vmem:[%s5208_s1 + $0x6a0] ss:$16 sps:$4 sm:$0xff]   ;;  %v3742_v36 = vld [vmem:[%s5208_s1 + $0x6a8] ss:$16 sps:$4 sm:$0xff]  }
  0x9c   :  { %2185 = vmatprep.subr.bf16.mxu0 %v3651_v37  ;;  %2450 = vmatprep.subr.bf16.mxu1 %v3654_v38  ;;  %v3747_v37 = vld [vmem:[%s5208_s1 + $0x6c4] ss:$16 sps:$4 sm:$0xff]   ;;  %v3750_v38 = vld [vmem:[%s5208_s1 + $0x6cc] ss:$16 sps:$4 sm:$0xff]  }
  0x9f   :  { %2186 = vmatpush1.bf16.msra.mxu0 %v3649_v39  ;;  %2451 = vmatpush1.bf16.msra.mxu1 %v3652_v40  ;;  %v3745_v39 = vld [vmem:[%s5208_s1 + $0x6c0] ss:$16 sps:$4 sm:$0xff]   ;;  %v3748_v40 = vld [vmem:[%s5208_s1 + $0x6c8] ss:$16 sps:$4 sm:$0xff]  }
  0xa0   :  { %2187 = vmatprep.subr.bf16.mxu0 %v3657_v41  ;;  %2452 = vmatprep.subr.bf16.mxu1 %v3660_v42  ;;  %v3753_v41 = vld [vmem:[%s5208_s1 + $0x6e4] ss:$16 sps:$4 sm:$0xff]   ;;  %v3756_v42 = vld [vmem:[%s5208_s1 + $0x6ec] ss:$16 sps:$4 sm:$0xff]  }
  0xa3   :  { %2188 = vmatpush1.bf16.msra.mxu0 %v3655_v43  ;;  %2453 = vmatpush1.bf16.msra.mxu1 %v3658_v44  ;;  %v3751_v43 = vld [vmem:[%s5208_s1 + $0x6e0] ss:$16 sps:$4 sm:$0xff]   ;;  %v3754_v44 = vld [vmem:[%s5208_s1 + $0x6e8] ss:$16 sps:$4 sm:$0xff]  }
  0xa4   :  { %2189 = vmatprep.subr.bf16.mxu0 %v3663_v45  ;;  %2454 = vmatprep.subr.bf16.mxu1 %v3666_v46  ;;  %v3759_v45 = vld [vmem:[%s5208_s1 + $0x704] ss:$16 sps:$4 sm:$0xff]   ;;  %v3762_v46 = vld [vmem:[%s5208_s1 + $0x70c] ss:$16 sps:$4 sm:$0xff]  }
  0xa7   :  { %2190 = vmatpush1.bf16.msra.mxu0 %v3661_v47  ;;  %2455 = vmatpush1.bf16.msra.mxu1 %v3664_v48  ;;  %v3757_v47 = vld [vmem:[%s5208_s1 + $0x700] ss:$16 sps:$4 sm:$0xff]   ;;  %v3760_v48 = vld [vmem:[%s5208_s1 + $0x708] ss:$16 sps:$4 sm:$0xff]  }
  0xa8   :  { %2191 = vmatprep.subr.bf16.mxu0 %v3669_v49  ;;  %2456 = vmatprep.subr.bf16.mxu1 %v3672_v50  ;;  %v3765_v49 = vld [vmem:[%s5208_s1 + $0x724] ss:$16 sps:$4 sm:$0xff]   ;;  %v3768_v50 = vld [vmem:[%s5208_s1 + $0x72c] ss:$16 sps:$4 sm:$0xff]  }
  0xab   :  { %2192 = vmatpush1.bf16.msra.mxu0 %v3667_v51  ;;  %2457 = vmatpush1.bf16.msra.mxu1 %v3670_v52  ;;  %v3763_v51 = vld [vmem:[%s5208_s1 + $0x720] ss:$16 sps:$4 sm:$0xff]   ;;  %v3766_v52 = vld [vmem:[%s5208_s1 + $0x728] ss:$16 sps:$4 sm:$0xff]  }
  0xac   :  { %2193 = vmatprep.subr.bf16.mxu0 %v3675_v53  ;;  %2458 = vmatprep.subr.bf16.mxu1 %v3678_v54 }
  0xaf   :  { %2194 = vmatpush1.bf16.msra.mxu0 %v3673_v55  ;;  %2459 = vmatpush1.bf16.msra.mxu1 %v3676_v56 }
  0xb0   :  { %2195 = vmatprep.subr.bf16.mxu0 %v3681_v57  ;;  %2460 = vmatprep.subr.bf16.mxu1 %v3684_v58 }
  0xb3   :  { %2196 = vmatpush1.bf16.msra.mxu0 %v3679_v59  ;;  %2461 = vmatpush1.bf16.msra.mxu1 %v3682_v60 }
  0xb4   :  { %2197 = vmatprep.subr.bf16.mxu0 %v3687_v61  ;;  %2462 = vmatprep.subr.bf16.mxu1 %v3690_v62 }
  0xb7   :  { %2198 = vmatpush1.bf16.msra.mxu0 %v3685_v63  ;;  %2463 = vmatpush1.bf16.msra.mxu1 %v3688_v0 }
  0xb8   :  { %2199 = vmatprep.subr.bf16.mxu0 %v3695_v1  ;;  %2464 = vmatprep.subr.bf16.mxu1 %v3698_v2 }
  0xbb   :  { %2200 = vmatpush1.bf16.msra.mxu0 %v3693_v3  ;;  %2465 = vmatpush1.bf16.msra.mxu1 %v3696_v4 }
  0xbc   :  { %2201 = vmatprep.subr.bf16.mxu0 %v3702_v5  ;;  %2466 = vmatprep.subr.bf16.mxu1 %v3705_v6 }
  0xbf   :  { %2202 = vmatpush1.bf16.msra.mxu0 %v3700_v7  ;;  %2467 = vmatpush1.bf16.msra.mxu1 %v3703_v8 }
  0xc0   :  { %2224 = vmatprep.subr.bf16.mxu0 %v3711_v9  ;;  %2489 = vmatprep.subr.bf16.mxu1 %v3714_v10 }
  0xc2   :  { %2204 = vmatmul.mubr.bf16.vlgmr.msra.gmra.mrb[0].mxu0 %v3706_v11  ;;  %2469 = vmatmul.mubr.bf16.vlgmr.msra.gmra.mrb[0].mxu1 %v3706_v11 }
  0xc3   :  { %2225 = vmatpush1.bf16.msra.mxu0 %v3709_v12  ;;  %2490 = vmatpush1.bf16.msra.mxu1 %v3712_v13 }
  0xc4   :  { %2226 = vmatprep.subr.bf16.mxu0 %v3717_v14  ;;  %2491 = vmatprep.subr.bf16.mxu1 %v3720_v15 }
  0xc5   :  { %2213 = vmatprep.mubr.bf16.mxu0 %v3793_v16  ;;  %2478 = vmatprep.mubr.bf16.mxu1 %v3793_v16 }
  0xc7   :  { %2227 = vmatpush1.bf16.msra.mxu0 %v3715_v17  ;;  %2492 = vmatpush1.bf16.msra.mxu1 %v3718_v18 }
  0xc8   :  { %2228 = vmatprep.subr.bf16.mxu0 %v3723_v19  ;;  %2493 = vmatprep.subr.bf16.mxu1 %v3726_v20 }
  0xca   :  { %2214 = vmatmul.mubr.bf16.gmra.mrb[4].mxu0 %v3801_v23  ;;  %2479 = vmatmul.mubr.bf16.gmra.mrb[4].mxu1 %v3801_v23 }
  0xcb   :  { %2229 = vmatpush1.bf16.msra.mxu0 %v3721_v21  ;;  %2494 = vmatpush1.bf16.msra.mxu1 %v3724_v22 }
  0xcc   :  { %2230 = vmatprep.subr.bf16.mxu0 %v3729_v24  ;;  %2495 = vmatprep.subr.bf16.mxu1 %v3732_v25 }
  0xcd   :  { %2256 = vmatprep.mubr.bf16.mxu0 %v3810_v26  ;;  %2521 = vmatprep.mubr.bf16.mxu1 %v3810_v26 }
  0xcf   :  { %2231 = vmatpush1.bf16.msra.mxu0 %v3727_v27  ;;  %2496 = vmatpush1.bf16.msra.mxu1 %v3730_v28 }
  0xd0   :  { %2232 = vmatprep.subr.bf16.mxu0 %v3735_v29  ;;  %2497 = vmatprep.subr.bf16.mxu1 %v3738_v30 }
  0xd3   :  { %2233 = vmatpush1.bf16.msra.mxu0 %v3733_v31  ;;  %2498 = vmatpush1.bf16.msra.mxu1 %v3736_v32 }
  0xd4   :  { %2234 = vmatprep.subr.bf16.mxu0 %v3741_v33  ;;  %2499 = vmatprep.subr.bf16.mxu1 %v3744_v34 }
  0xd7   :  { %2235 = vmatpush1.bf16.msra.mxu0 %v3739_v35  ;;  %2500 = vmatpush1.bf16.msra.mxu1 %v3742_v36 }
  0xd8   :  { %2236 = vmatprep.subr.bf16.mxu0 %v3747_v37  ;;  %2501 = vmatprep.subr.bf16.mxu1 %v3750_v38 }
  0xdb   :  { %2237 = vmatpush1.bf16.msra.mxu0 %v3745_v39  ;;  %2502 = vmatpush1.bf16.msra.mxu1 %v3748_v40 }
  0xdc   :  { %2238 = vmatprep.subr.bf16.mxu0 %v3753_v41  ;;  %2503 = vmatprep.subr.bf16.mxu1 %v3756_v42 }
  0xdf   :  { %2239 = vmatpush1.bf16.msra.mxu0 %v3751_v43  ;;  %2504 = vmatpush1.bf16.msra.mxu1 %v3754_v44 }
  0xe0   :  { %2240 = vmatprep.subr.bf16.mxu0 %v3759_v45  ;;  %2505 = vmatprep.subr.bf16.mxu1 %v3762_v46 }
  0xe3   :  { %2241 = vmatpush1.bf16.msra.mxu0 %v3757_v47  ;;  %2506 = vmatpush1.bf16.msra.mxu1 %v3760_v48 }
  0xe4   :  { %11 = vsyncpa [#allocation3], 0  ;;  %2242 = vmatprep.subr.bf16.mxu0 %v3765_v49  ;;  %2507 = vmatprep.subr.bf16.mxu1 %v3768_v50  ;;  %v3771_v53 = vld [vmem:[%s5208_s1 + $0x744] ss:$16 sps:$4 sm:$0xff]   ;;  %v3774_v54 = vld [vmem:[%s5208_s1 + $0x74c] ss:$16 sps:$4 sm:$0xff]  }
  0xe5   :  { %v3769_v55 = vld [vmem:[%s5208_s1 + $0x740] ss:$16 sps:$4 sm:$0xff]   ;;  %v3772_v56 = vld [vmem:[%s5208_s1 + $0x748] ss:$16 sps:$4 sm:$0xff]   ;;  %v3777_v57 = vld [vmem:[%s5208_s1 + $0x764] ss:$16 sps:$4 sm:$0xff]  }
  0xe6   :  { %v3780_v58 = vld [vmem:[%s5208_s1 + $0x76c] ss:$16 sps:$4 sm:$0xff]   ;;  %v3775_v59 = vld [vmem:[%s5208_s1 + $0x760] ss:$16 sps:$4 sm:$0xff]   ;;  %v3778_v60 = vld [vmem:[%s5208_s1 + $0x768] ss:$16 sps:$4 sm:$0xff]  }
  0xe7   :  { %2243 = vmatpush1.bf16.msra.mxu0 %v3763_v51  ;;  %2508 = vmatpush1.bf16.msra.mxu1 %v3766_v52  ;;  %v3783_v61 = vld [vmem:[%s5208_s1 + $0x784] ss:$16 sps:$4 sm:$0xff]   ;;  %v3786_v62 = vld [vmem:[%s5208_s1 + $0x78c] ss:$16 sps:$4 sm:$0xff]   ;;  %v3781_v63 = vld [vmem:[%s5208_s1 + $0x780] ss:$16 sps:$4 sm:$0xff]  }
  0xe8   :  { %2244 = vmatprep.subr.bf16.mxu0 %v3771_v53  ;;  %2509 = vmatprep.subr.bf16.mxu1 %v3774_v54  ;;  %v3784_v0 = vld [vmem:[%s5208_s1 + $0x788] ss:$16 sps:$4 sm:$0xff]   ;;  %v3789_v1 = vld [vmem:[%s5208_s1 + $0x7a4] ss:$16 sps:$4 sm:$0xff]   ;;  %v3792_v2 = vld [vmem:[%s5208_s1 + $0x7ac] ss:$16 sps:$4 sm:$0xff]  }
  0xe9   :  { %v3787_v3 = vld [vmem:[%s5208_s1 + $0x7a0] ss:$16 sps:$4 sm:$0xff]   ;;  %v3790_v4 = vld [vmem:[%s5208_s1 + $0x7a8] ss:$16 sps:$4 sm:$0xff]   ;;  %v3797_v5 = vld [vmem:[%s5208_s1 + $0x7c4] ss:$16 sps:$4 sm:$0xff]  }
  0xea   :  { %v3800_v6 = vld [vmem:[%s5208_s1 + $0x7cc] ss:$16 sps:$4 sm:$0xff]   ;;  %v3795_v7 = vld [vmem:[%s5208_s1 + $0x7c0] ss:$16 sps:$4 sm:$0xff]   ;;  %v3798_v8 = vld [vmem:[%s5208_s1 + $0x7c8] ss:$16 sps:$4 sm:$0xff]  }
  0xeb   :  { %2245 = vmatpush1.bf16.msra.mxu0 %v3769_v55  ;;  %2510 = vmatpush1.bf16.msra.mxu1 %v3772_v56  ;;  %v3804_v9 = vld [vmem:[%s5208_s1 + $0x7e4] ss:$16 sps:$4 sm:$0xff]   ;;  %v3807_v10 = vld [vmem:[%s5208_s1 + $0x7ec] ss:$16 sps:$4 sm:$0xff]   ;;  %v3802_v11 = vld [vmem:[%s5208_s1 + $0x7e0] ss:$16 sps:$4 sm:$0xff]  }
  0xec   :  { %2246 = vmatprep.subr.bf16.mxu0 %v3777_v57  ;;  %2511 = vmatprep.subr.bf16.mxu1 %v3780_v58  ;;  %v3805_v12 = vld [vmem:[%s5208_s1 + $0x7e8] ss:$16 sps:$4 sm:$0xff]   ;;  %v3813_v13 = vld [vmem:[%s5208_s1 + $0x804] ss:$16 sps:$4 sm:$0xff]   ;;  %v3816_v14 = vld [vmem:[%s5208_s1 + $0x80c] ss:$16 sps:$4 sm:$0xff]  }
  0xed   :  { %v3808_v15 = vld [vmem:[%s5207_s0 + $0x18] ss:$40 sps:$4 sm:$0xff]   ;;  %v3819_v18 = vld [vmem:[%s5208_s1 + $0x824] ss:$16 sps:$4 sm:$0xff]   ;;  %v3822_v19 = vld [vmem:[%s5208_s1 + $0x82c] ss:$16 sps:$4 sm:$0xff]  }
  0xee   :  { %v3811_v16 = vld [vmem:[%s5208_s1 + $0x800] ss:$16 sps:$4 sm:$0xff]   ;;  %v3814_v17 = vld [vmem:[%s5208_s1 + $0x808] ss:$16 sps:$4 sm:$0xff]   ;;  %v3895_v20 = vld [vmem:[%s5207_s0 + $0x6c] ss:$40 sps:$4 sm:$0xff]  }
  0xef   :  { %2247 = vmatpush1.bf16.msra.mxu0 %v3775_v59  ;;  %2512 = vmatpush1.bf16.msra.mxu1 %v3778_v60  ;;  %v3817_v21 = vld [vmem:[%s5208_s1 + $0x820] ss:$16 sps:$4 sm:$0xff]   ;;  %v3820_v22 = vld [vmem:[%s5208_s1 + $0x828] ss:$16 sps:$4 sm:$0xff]   ;;  %v3825_v23 = vld [vmem:[%s5208_s1 + $0x844] ss:$16 sps:$4 sm:$0xff]  }
  0xf0   :  { %2248 = vmatprep.subr.bf16.mxu0 %v3783_v61  ;;  %2513 = vmatprep.subr.bf16.mxu1 %v3786_v62  ;;  %v3828_v24 = vld [vmem:[%s5208_s1 + $0x84c] ss:$16 sps:$4 sm:$0xff]   ;;  %v3897_v25 = vld [vmem:[%s5207_s0 + $0x68] ss:$40 sps:$4 sm:$0xff]   ;;  %v3831_v28 = vld [vmem:[%s5208_s1 + $0x864] ss:$16 sps:$4 sm:$0xff]  }
  0xf1   :  { %v3823_v26 = vld [vmem:[%s5208_s1 + $0x840] ss:$16 sps:$4 sm:$0xff]   ;;  %v3826_v27 = vld [vmem:[%s5208_s1 + $0x848] ss:$16 sps:$4 sm:$0xff]   ;;  %v3834_v29 = vld [vmem:[%s5208_s1 + $0x86c] ss:$16 sps:$4 sm:$0xff]  }
  0xf2   :  { %v3912_v30 = vld [vmem:[%s5207_s0 + $0x24] ss:$40 sps:$4 sm:$0xff]   ;;  %v3829_v31 = vld [vmem:[%s5208_s1 + $0x860] ss:$16 sps:$4 sm:$0xff]   ;;  %v3832_v32 = vld [vmem:[%s5208_s1 + $0x868] ss:$16 sps:$4 sm:$0xff]  }
  0xf3   :  { %2249 = vmatpush1.bf16.msra.mxu0 %v3781_v63  ;;  %2514 = vmatpush1.bf16.msra.mxu1 %v3784_v0  ;;  %v3837_v33 = vld [vmem:[%s5208_s1 + $0x884] ss:$16 sps:$4 sm:$0xff]   ;;  %v3840_v34 = vld [vmem:[%s5208_s1 + $0x88c] ss:$16 sps:$4 sm:$0xff]   ;;  %v3835_v35 = vld [vmem:[%s5208_s1 + $0x880] ss:$16 sps:$4 sm:$0xff]  }
  0xf4   :  { %2250 = vmatprep.subr.bf16.mxu0 %v3789_v1  ;;  %2515 = vmatprep.subr.bf16.mxu1 %v3792_v2  ;;  %v3838_v36 = vld [vmem:[%s5208_s1 + $0x888] ss:$16 sps:$4 sm:$0xff]   ;;  %v3843_v37 = vld [vmem:[%s5208_s1 + $0x8a4] ss:$16 sps:$4 sm:$0xff]   ;;  %v3846_v38 = vld [vmem:[%s5208_s1 + $0x8ac] ss:$16 sps:$4 sm:$0xff]  }
  0xf5   :  { %v3841_v39 = vld [vmem:[%s5208_s1 + $0x8a0] ss:$16 sps:$4 sm:$0xff]   ;;  %v3844_v40 = vld [vmem:[%s5208_s1 + $0x8a8] ss:$16 sps:$4 sm:$0xff]   ;;  %v3849_v41 = vld [vmem:[%s5208_s1 + $0x8c4] ss:$16 sps:$4 sm:$0xff]  }
  0xf6   :  { %v3852_v42 = vld [vmem:[%s5208_s1 + $0x8cc] ss:$16 sps:$4 sm:$0xff]   ;;  %v3847_v43 = vld [vmem:[%s5208_s1 + $0x8c0] ss:$16 sps:$4 sm:$0xff]   ;;  %v3850_v44 = vld [vmem:[%s5208_s1 + $0x8c8] ss:$16 sps:$4 sm:$0xff]  }
  0xf7   :  { %2251 = vmatpush1.bf16.msra.mxu0 %v3787_v3  ;;  %2516 = vmatpush1.bf16.msra.mxu1 %v3790_v4  ;;  %v3855_v45 = vld [vmem:[%s5208_s1 + $0x8e4] ss:$16 sps:$4 sm:$0xff]   ;;  %v3858_v46 = vld [vmem:[%s5208_s1 + $0x8ec] ss:$16 sps:$4 sm:$0xff]   ;;  %v3853_v47 = vld [vmem:[%s5208_s1 + $0x8e0] ss:$16 sps:$4 sm:$0xff]  }
  0xf8   :  { %2252 = vmatprep.subr.bf16.mxu0 %v3797_v5  ;;  %2517 = vmatprep.subr.bf16.mxu1 %v3800_v6  ;;  %v3856_v48 = vld [vmem:[%s5208_s1 + $0x8e8] ss:$16 sps:$4 sm:$0xff]   ;;  %v3861_v49 = vld [vmem:[%s5208_s1 + $0x904] ss:$16 sps:$4 sm:$0xff]   ;;  %v3864_v50 = vld [vmem:[%s5208_s1 + $0x90c] ss:$16 sps:$4 sm:$0xff]  }
  0xf9   :  { %v3859_v51 = vld [vmem:[%s5208_s1 + $0x900] ss:$16 sps:$4 sm:$0xff]   ;;  %v3862_v52 = vld [vmem:[%s5208_s1 + $0x908] ss:$16 sps:$4 sm:$0xff]   ;;  %v3867_v53 = vld [vmem:[%s5208_s1 + $0x924] ss:$16 sps:$4 sm:$0xff]  }
  0xfa   :  { %v3870_v54 = vld [vmem:[%s5208_s1 + $0x92c] ss:$16 sps:$4 sm:$0xff]   ;;  %v3865_v55 = vld [vmem:[%s5208_s1 + $0x920] ss:$16 sps:$4 sm:$0xff]   ;;  %v3868_v56 = vld [vmem:[%s5208_s1 + $0x928] ss:$16 sps:$4 sm:$0xff]  }
  0xfb   :  { %2253 = vmatpush1.bf16.msra.mxu0 %v3795_v7  ;;  %2518 = vmatpush1.bf16.msra.mxu1 %v3798_v8  ;;  %v3873_v57 = vld [vmem:[%s5208_s1 + $0x944] ss:$16 sps:$4 sm:$0xff]   ;;  %v3876_v58 = vld [vmem:[%s5208_s1 + $0x94c] ss:$16 sps:$4 sm:$0xff]   ;;  %v3871_v59 = vld [vmem:[%s5208_s1 + $0x940] ss:$16 sps:$4 sm:$0xff]  }
  0xfc   :  { %2254 = vmatprep.subr.bf16.mxu0 %v3804_v9  ;;  %2519 = vmatprep.subr.bf16.mxu1 %v3807_v10  ;;  %v3874_v60 = vld [vmem:[%s5208_s1 + $0x948] ss:$16 sps:$4 sm:$0xff]   ;;  %v3879_v61 = vld [vmem:[%s5208_s1 + $0x964] ss:$16 sps:$4 sm:$0xff]   ;;  %v3882_v62 = vld [vmem:[%s5208_s1 + $0x96c] ss:$16 sps:$4 sm:$0xff]  }
  0xfd   :  { %v3877_v63 = vld [vmem:[%s5208_s1 + $0x960] ss:$16 sps:$4 sm:$0xff]   ;;  %v3880_v0 = vld [vmem:[%s5208_s1 + $0x968] ss:$16 sps:$4 sm:$0xff]   ;;  %v3885_v1 = vld [vmem:[%s5208_s1 + $0x984] ss:$16 sps:$4 sm:$0xff]  }
  0xfe   :  { %v3888_v2 = vld [vmem:[%s5208_s1 + $0x98c] ss:$16 sps:$4 sm:$0xff]   ;;  %v3883_v3 = vld [vmem:[%s5208_s1 + $0x980] ss:$16 sps:$4 sm:$0xff]   ;;  %v3886_v4 = vld [vmem:[%s5208_s1 + $0x988] ss:$16 sps:$4 sm:$0xff]  }
  0xff   :  { %2255 = vmatpush1.bf16.msra.mxu0 %v3802_v11  ;;  %2520 = vmatpush1.bf16.msra.mxu1 %v3805_v12  ;;  %v3891_v5 = vld [vmem:[%s5208_s1 + $0x9a4] ss:$16 sps:$4 sm:$0xff]   ;;  %v3894_v6 = vld [vmem:[%s5208_s1 + $0x9ac] ss:$16 sps:$4 sm:$0xff]   ;;  %v3889_v7 = vld [vmem:[%s5208_s1 + $0x9a0] ss:$16 sps:$4 sm:$0xff]  }
 0x100   :  { %2277 = vmatprep.subr.bf16.mxu0 %v3813_v13  ;;  %2542 = vmatprep.subr.bf16.mxu1 %v3816_v14  ;;  %v3892_v8 = vld [vmem:[%s5208_s1 + $0x9a8] ss:$16 sps:$4 sm:$0xff]   ;;  %v3900_v9 = vld [vmem:[%s5208_s1 + $0x9c4] ss:$16 sps:$4 sm:$0xff]   ;;  %v3903_v10 = vld [vmem:[%s5208_s1 + $0x9cc] ss:$16 sps:$4 sm:$0xff]  }
 0x101   :  { %v3898_v11 = vld [vmem:[%s5208_s1 + $0x9c0] ss:$16 sps:$4 sm:$0xff]   ;;  %v3901_v12 = vld [vmem:[%s5208_s1 + $0x9c8] ss:$16 sps:$4 sm:$0xff]   ;;  %v3906_v13 = vld [vmem:[%s5208_s1 + $0x9e4] ss:$16 sps:$4 sm:$0xff]  }
 0x102   :  { %2257 = vmatmul.mubr.bf16.vlgmr.msra.gmra.mrb[0].mxu0 %v3808_v15  ;;  %2522 = vmatmul.mubr.bf16.vlgmr.msra.gmra.mrb[0].mxu1 %v3808_v15  ;;  %v3909_v14 = vld [vmem:[%s5208_s1 + $0x9ec] ss:$16 sps:$4 sm:$0xff]   ;;  %v3904_v15 = vld [vmem:[%s5208_s1 + $0x9e0] ss:$16 sps:$4 sm:$0xff]   ;;  %vm2829_vm0 = vcmask 261120  }
 0x103   :  { %2278 = vmatpush1.bf16.msra.mxu0 %v3811_v16  ;;  %2543 = vmatpush1.bf16.msra.mxu1 %v3814_v17  ;;  %v3907_v16 = vld [vmem:[%s5208_s1 + $0x9e8] ss:$16 sps:$4 sm:$0xff]  }
 0x104   :  { %2279 = vmatprep.subr.bf16.mxu0 %v3819_v18  ;;  %2544 = vmatprep.subr.bf16.mxu1 %v3822_v19  ;;  %v3910_v17 = vld [vmem:[%s5207_s0 + $0x20] ss:$40 sps:$4 sm:$0xff]   ;;  %v3913_v18 = vld [vmem:[%s5207_s0 + $0x74] ss:$40 sps:$4 sm:$0xff]   ;;  %v3915_v19 = vld [vmem:[%s5207_s0 + $0x70] ss:$40 sps:$4 sm:$0xff]  }
 0x105   :  { %2266 = vmatprep.mubr.bf16.mxu0 %v3895_v20  ;;  %2531 = vmatprep.mubr.bf16.mxu1 %v3895_v20  ;;  %v4006_v20 = vmov 0  }
 0x106   :  { %3404 = vset.pattern.permute.xlu0 %v4006_v20  ;;  %3405 = vset.pattern.permute.xlu1 %v4006_v20 }
 0x107   :  { %2280 = vmatpush1.bf16.msra.mxu0 %v3817_v21  ;;  %2545 = vmatpush1.bf16.msra.mxu1 %v3820_v22  ;;  %v2795_v21 = vld [vmem:[%s5212_s5] sm:$0xff]  ;;  %v2797_v22 = vld [vmem:[%s5212_s5 + $0x10] sm:$0xff] }
 0x108   :  { %2281 = vmatprep.subr.bf16.mxu0 %v3825_v23  ;;  %2546 = vmatprep.subr.bf16.mxu1 %v3828_v24  ;;  %v2796_v23 = vld [vmem:[%s5212_s5 + $0x8] sm:$0xff]  ;;  %v2798_v24 = vld [vmem:[%s5212_s5 + $0x18] sm:$0xff] }
 0x109   :  { %2801 = vperm.xlu0 %3404, %v2795_v21   ;;  %2811 = vperm.xlu1 %3405, %v2797_v22  }
 0x10a   :  { %2267 = vmatmul.mubr.bf16.gmra.mrb[4].mxu0 %v3897_v25  ;;  %2532 = vmatmul.mubr.bf16.gmra.mrb[4].mxu1 %v3897_v25  ;;  %v2597_v25 = vlaneseq }
 0x10b   :  { %2282 = vmatpush1.bf16.msra.mxu0 %v3823_v26  ;;  %2547 = vmatpush1.bf16.msra.mxu1 %v3826_v27 }
 0x10c   :  { %2283 = vmatprep.subr.bf16.mxu0 %v3831_v28  ;;  %2548 = vmatprep.subr.bf16.mxu1 %v3834_v29  ;;  %v2598_v26 = vshrl.u32 %v2597_v25, 7  ;;  %v2595_v29 = vld [vmem:[%s5209_s2] sm:$0xf] }
 0x10d   :  { %2309 = vmatprep.mubr.bf16.mxu0 %v3912_v30  ;;  %2574 = vmatprep.mubr.bf16.mxu1 %v3912_v30 }
 0x10e   :  { %2806 = vperm.xlu0 %3404, %v2796_v23   ;;  %2816 = vperm.xlu1 %3405, %v2798_v24   ;;  %v2599_v27 = vsub.s32 0, %v2598_v26  ;;  %v2607_v28 = vsub.s32 2, %v2598_v26  ;;  %v2603_v30 = vsub.s32 1, %v2598_v26 }
 0x10f   :  { %2284 = vmatpush1.bf16.msra.mxu0 %v3829_v31  ;;  %2549 = vmatpush1.bf16.msra.mxu1 %v3832_v32  ;;  %v2611_v31 = vsub.s32 3, %v2598_v26  ;;  %v2633_v32 = vld [vmem:[%s5210_s3] sm:$0xf] }
 0x110   :  { %2285 = vmatprep.subr.bf16.mxu0 %v3837_v33  ;;  %2550 = vmatprep.subr.bf16.mxu1 %v3840_v34  ;;  %v2600_v33 = vrot.slane %v2595_v29, %v2599_v27  ;;  %v5087_v34 = vrot.slane %v2595_v29, %v2607_v28 }
 0x113   :  { %2286 = vmatpush1.bf16.msra.mxu0 %v3835_v35  ;;  %2551 = vmatpush1.bf16.msra.mxu1 %v3838_v36  ;;  %v5089_v35 = vrot.slane %v2595_v29, %v2603_v30  ;;  %v5091_v36 = vrot.slane %v2595_v29, %v2611_v31 }
 0x114   :  { %2287 = vmatprep.subr.bf16.mxu0 %v3843_v37  ;;  %2552 = vmatprep.subr.bf16.mxu1 %v3846_v38  ;;  %v2638_v37 = vrot.slane %v2633_v32, %v2599_v27  ;;  %v5093_v38 = vrot.slane %v2633_v32, %v2607_v28 }
 0x117   :  { %2288 = vmatpush1.bf16.msra.mxu0 %v3841_v39  ;;  %2553 = vmatpush1.bf16.msra.mxu1 %v3844_v40 }
 0x118   :  { %2289 = vmatprep.subr.bf16.mxu0 %v3849_v41  ;;  %2554 = vmatprep.subr.bf16.mxu1 %v3852_v42  ;;  %v5095_v41 = vrot.slane %v2633_v32, %v2603_v30  ;;  %v5097_v42 = vrot.slane %v2633_v32, %v2611_v31 }
 0x11b   :  { %2290 = vmatpush1.bf16.msra.mxu0 %v3847_v43  ;;  %2555 = vmatpush1.bf16.msra.mxu1 %v3850_v44 }
 0x11c   :  { %2291 = vmatprep.subr.bf16.mxu0 %v3855_v45  ;;  %2556 = vmatprep.subr.bf16.mxu1 %v3858_v46 }
 0x11f   :  { %2292 = vmatpush1.bf16.msra.mxu0 %v3853_v47  ;;  %2557 = vmatpush1.bf16.msra.mxu1 %v3856_v48 }
 0x120   :  { %2293 = vmatprep.subr.bf16.mxu0 %v3861_v49  ;;  %2558 = vmatprep.subr.bf16.mxu1 %v3864_v50 }
 0x123   :  { %2294 = vmatpush1.bf16.msra.mxu0 %v3859_v51  ;;  %2559 = vmatpush1.bf16.msra.mxu1 %v3862_v52 }
 0x124   :  { %2295 = vmatprep.subr.bf16.mxu0 %v3867_v53  ;;  %2560 = vmatprep.subr.bf16.mxu1 %v3870_v54 }
 0x127   :  { %2296 = vmatpush1.bf16.msra.mxu0 %v3865_v55  ;;  %2561 = vmatpush1.bf16.msra.mxu1 %v3868_v56 }
 0x128   :  { %2297 = vmatprep.subr.bf16.mxu0 %v3873_v57  ;;  %2562 = vmatprep.subr.bf16.mxu1 %v3876_v58 }
 0x12b   :  { %2298 = vmatpush1.bf16.msra.mxu0 %v3871_v59  ;;  %2563 = vmatpush1.bf16.msra.mxu1 %v3874_v60 }
 0x12c   :  { %2299 = vmatprep.subr.bf16.mxu0 %v3879_v61  ;;  %2564 = vmatprep.subr.bf16.mxu1 %v3882_v62 }
 0x12f   :  { %2300 = vmatpush1.bf16.msra.mxu0 %v3877_v63  ;;  %2565 = vmatpush1.bf16.msra.mxu1 %v3880_v0 }
 0x130   :  { %2301 = vmatprep.subr.bf16.mxu0 %v3885_v1  ;;  %2566 = vmatprep.subr.bf16.mxu1 %v3888_v2 }
 0x133   :  { %2302 = vmatpush1.bf16.msra.mxu0 %v3883_v3  ;;  %2567 = vmatpush1.bf16.msra.mxu1 %v3886_v4 }
 0x134   :  { %2303 = vmatprep.subr.bf16.mxu0 %v3891_v5  ;;  %2568 = vmatprep.subr.bf16.mxu1 %v3894_v6 }
 0x137   :  { %2304 = vmatpush1.bf16.msra.mxu0 %v3889_v7  ;;  %2569 = vmatpush1.bf16.msra.mxu1 %v3892_v8 }
 0x138   :  { %2305 = vmatprep.subr.bf16.mxu0 %v3900_v9  ;;  %2570 = vmatprep.subr.bf16.mxu1 %v3903_v10 }
 0x13b   :  { %2306 = vmatpush1.bf16.msra.mxu0 %v3898_v11  ;;  %2571 = vmatpush1.bf16.msra.mxu1 %v3901_v12 }
 0x13c   :  { %2307 = vmatprep.subr.bf16.mxu0 %v3906_v13  ;;  %2572 = vmatprep.subr.bf16.mxu1 %v3909_v14 }
 0x13f   :  { %2308 = vmatpush1.bf16.msra.mxu0 %v3904_v15  ;;  %2573 = vmatpush1.bf16.msra.mxu1 %v3907_v16 }
 0x142   :  { %2310 = vmatmul.mubr.bf16.vlgmr.msra.gmra.mrb[0].mxu0 %v3910_v17  ;;  %2575 = vmatmul.mubr.bf16.vlgmr.msra.gmra.mrb[0].mxu1 %v3910_v17 }
 0x143   :  { %2319 = vmatprep.mubr.bf16.mxu0 %v3913_v18  ;;  %2584 = vmatprep.mubr.bf16.mxu1 %v3913_v18 }
 0x14a   :  { %2320 = vmatmul.mubr.bf16.gmra.mrb[4].mxu0 %v3915_v19  ;;  %2585 = vmatmul.mubr.bf16.gmra.mrb[4].mxu1 %v3915_v19 }
 0x14b   :  { %2868 = vmatprep.mubr.bf16.mxu0 %v4006_v20  ;;  %2921 = vmatprep.mubr.bf16.mxu1 %v4006_v20 }
 0x215   :  { %v2311_v39 = vpop.f32.mrb[0].mxu0  ;;  %v2576_v40 = vpop.f32.mrb[0].mxu1 }
 0x216   :  { %v2617_v43 = vmul.f32 %v2600_v33, %v2311_v39  ;;  %v2619_v44 = vmul.f32 %v5087_v34, %v2576_v40  ;;  %v2313_v45 = vpop.f32.mrb[1].mxu0  ;;  %v2578_v46 = vpop.f32.mrb[1].mxu1 }
 0x217   :  { %v2618_v47 = vmul.f32 %v5089_v35, %v2313_v45  ;;  %v2620_v48 = vmul.f32 %v5091_v36, %v2578_v46  ;;  %v2315_v49 = vpop.f32.mrb[2].mxu0  ;;  %v2580_v50 = vpop.f32.mrb[2].mxu1 }
 0x218   :  { %v5102_v51 = vadd.f32 %v2638_v37, %v2617_v43  ;;  %v5105_v52 = vadd.f32 %v5093_v38, %v2619_v44  ;;  %v2621_v53 = vmul.f32 %v2600_v33, %v2315_v49  ;;  %v2623_v54 = vmul.f32 %v5087_v34, %v2580_v50  ;;  %v2317_v55 = vpop.f32.mrb[3].mxu0  ;;  %v2582_v56 = vpop.f32.mrb[3].mxu1 }
 0x219   :  { %v5109_v57 = vadd.f32 %v5095_v41, %v2618_v47  ;;  %v5112_v58 = vadd.f32 %v5097_v42, %v2620_v48  ;;  %v2622_v59 = vmul.f32 %v5089_v35, %v2317_v55  ;;  %v2624_v60 = vmul.f32 %v5091_v36, %v2582_v56 }
 0x21a   :  { %v3314_v61 = vmul.f32 -1.442695, %v5102_v51  ;;  %v3316_v62 = vmul.f32 -1.442695, %v5105_v52  ;;  %v5118_v63 = vadd.f32 %v2638_v37, %v2621_v53  ;;  %v5121_v0 = vadd.f32 %v5093_v38, %v2623_v54 }
 0x21b   :  { %v3315_v1 = vmul.f32 -1.442695, %v5109_v57  ;;  %v3317_v2 = vmul.f32 -1.442695, %v5112_v58  ;;  %v5126_v3 = vadd.f32 %v5095_v41, %v2622_v59  ;;  %v5129_v4 = vadd.f32 %v5097_v42, %v2624_v60 }
 0x21c   :  { %3918 = vpow2.f32 %v3314_v61  ;;  %v3318_v5 = vmul.f32 -1.442695, %v5118_v63  ;;  %v3320_v6 = vmul.f32 -1.442695, %v5121_v0 }
 0x21d   :  { %3920 = vpow2.f32 %v3316_v62  ;;  %v2321_v7 = vpop.f32.mrb[4].mxu0  ;;  %v2586_v8 = vpop.f32.mrb[4].mxu1  ;;  %v3319_v9 = vmul.f32 -1.442695, %v5126_v3  ;;  %v3321_v14 = vmul.f32 -1.442695, %v5129_v4 }
 0x21e   :  { %3922 = vpow2.f32 %v3315_v1  ;;  %v2625_v10 = vmul.f32 %v2600_v33, %v2321_v7  ;;  %v2627_v11 = vmul.f32 %v5087_v34, %v2586_v8  ;;  %v2323_v12 = vpop.f32.mrb[5].mxu0  ;;  %v2588_v13 = vpop.f32.mrb[5].mxu1 }
 0x21f   :  { %3924 = vpow2.f32 %v3317_v2  ;;  %v2626_v15 = vmul.f32 %v5089_v35, %v2323_v12  ;;  %v2325_v16 = vpop.f32.mrb[6].mxu0  ;;  %v2590_v17 = vpop.f32.mrb[6].mxu1  ;;  %v2628_v30 = vmul.f32 %v5091_v36, %v2588_v13 }
 0x220   :  { %3926 = vpow2.f32 %v3318_v5  ;;  %v5137_v18 = vadd.f32 %v2638_v37, %v2625_v10  ;;  %v5140_v19 = vadd.f32 %v5093_v38, %v2627_v11  ;;  %v2629_v21 = vmul.f32 %v2600_v33, %v2325_v16  ;;  %v2327_v22 = vpop.f32.mrb[7].mxu0  ;;  %v2592_v23 = vpop.f32.mrb[7].mxu1 }
 0x221   :  { %3928 = vpow2.f32 %v3320_v6  ;;  %v5143_v24 = vadd.f32 %v5095_v41, %v2626_v15  ;;  %v5153_v44 = vadd.f32 %v5097_v42, %v2628_v30  ;;  %v2631_v47 = vmul.f32 %v5087_v34, %v2590_v17 }
 0x222   :  { %3930 = vpow2.f32 %v3319_v9  ;;  %v3322_v25 = vmul.f32 -1.442695, %v5137_v18  ;;  %v3324_v26 = vmul.f32 -1.442695, %v5140_v19  ;;  %v5147_v27 = vadd.f32 %v2638_v37, %v2629_v21 }
 0x223   :  { %3932 = vpow2.f32 %v3321_v14  ;;  %v3323_v28 = vmul.f32 -1.442695, %v5143_v24  ;;  %v2630_v50 = vmul.f32 %v5089_v35, %v2327_v22  ;;  %v2632_v55 = vmul.f32 %v5091_v36, %v2592_v23 }
 0x224   :  { %3934 = vpow2.f32 %v3322_v25  ;;  %v3326_v29 = vmul.f32 -1.442695, %v5147_v27  ;;  %v3325_v60 = vmul.f32 -1.442695, %v5153_v44  ;;  %v5160_v34 = vadd.f32 %v5093_v38, %v2631_v47 }
 0x225   :  { %3936 = vpow2.f32 %v3324_v26  ;;  %v5163_v35 = vadd.f32 %v5095_v41, %v2630_v50  ;;  %v5166_v36 = vadd.f32 %v5097_v42, %v2632_v55 }
 0x226   :  { %v3919_v31 = vpop.eup %3918  ;;  %3938 = vpow2.f32 %v3323_v28  ;;  %v3328_v7 = vmul.f32 -1.442695, %v5160_v34 }
 0x227   :  { %v3921_v32 = vpop.eup %3920  ;;  %v2719_v33 = vadd.f32 1.0, %v3919_v31  ;;  %3940 = vpow2.f32 %v3326_v29  ;;  %v3327_v38 = vmul.f32 -1.442695, %v5163_v35  ;;  %v3329_v11 = vmul.f32 -1.442695, %v5166_v36 }
 0x228   :  { %v3923_v39 = vpop.eup %3922  ;;  %v2721_v40 = vadd.f32 1.0, %v3921_v32 }
 0x229   :  { %v3925_v43 = vpop.eup %3924  ;;  %3942 = vrcp.f32 %v2719_v33  ;;  %v2720_v37 = vadd.f32 1.0, %v3923_v39 }
 0x22a   :  { %v3927_v45 = vpop.eup %3926  ;;  %3944 = vrcp.f32 %v2721_v40  ;;  %v2722_v46 = vadd.f32 1.0, %v3925_v43 }
 0x22b   :  { %v3929_v48 = vpop.eup %3928  ;;  %3946 = vrcp.f32 %v2720_v37  ;;  %v2723_v49 = vadd.f32 1.0, %v3927_v45 }
 0x22c   :  { %v3931_v53 = vpop.eup %3930  ;;  %3948 = vrcp.f32 %v2722_v46  ;;  %v2725_v54 = vadd.f32 1.0, %v3929_v48 }
 0x22d   :  { %v3933_v56 = vpop.eup %3932  ;;  %3950 = vrcp.f32 %v2723_v49  ;;  %v2724_v59 = vadd.f32 1.0, %v3931_v53 }
 0x22e   :  { %v3935_v61 = vpop.eup %3934  ;;  %3952 = vrcp.f32 %v2725_v54  ;;  %v2726_v62 = vadd.f32 1.0, %v3933_v56 }
 0x22f   :  { %3954 = vrcp.f32 %v2724_v59  ;;  %v2727_v1 = vadd.f32 1.0, %v3935_v61  ;;  %v3937_v2 = vpop.eup %3936 }
 0x230   :  { %3956 = vrcp.f32 %v2726_v62  ;;  %v3939_v5 = vpop.eup %3938  ;;  %v2729_v31 = vadd.f32 1.0, %v3937_v2  ;;  %v3916_v2 = vld [vmem:[%s5211_s4] sm:$0xff]  }
 0x231   :  { %3958 = vpow2.f32 %v3325_v60  ;;  %v3941_v6 = vpop.eup %3940  ;;  %v2728_v33 = vadd.f32 1.0, %v3939_v5 }
 0x232   :  { %3960 = vrcp.f32 %v2727_v1  ;;  %v2731_v9 = vadd.f32 1.0, %v3941_v6 }
 0x233   :  { %v3943_v8 = vpop.eup %3942 }
 0x234   :  { %v3945_v10 = vpop.eup %3944  ;;  %3962 = vrcp.f32 %v2731_v9  ;;  %v2767_v14 = vmul.f32 %v3943_v8, %v5102_v51 }
 0x235   :  { %v3947_v41 = vpop.eup %3946  ;;  %3964 = vpow2.f32 %v3328_v7  ;;  %v2769_v17 = vmul.f32 %v3945_v10, %v5105_v52 }
 0x236   :  { %v3949_v12 = vpop.eup %3948  ;;  %3966 = vpow2.f32 %v3327_v38  ;;  %v2768_v23 = vmul.f32 %v3947_v41, %v5109_v57 }
 0x237   :  { %v3951_v13 = vpop.eup %3950  ;;  %3968 = vpow2.f32 %v3329_v11  ;;  %v2770_v29 = vmul.f32 %v3949_v12, %v5112_v58 }
 0x238   :  { %v3953_v42 = vpop.eup %3952  ;;  %v2771_v15 = vmul.f32 %v3951_v13, %v5118_v63  ;;  %3970 = vrcp.f32 %v2729_v31 }
 0x239   :  { %v3955_v16 = vpop.eup %3954  ;;  %v2773_v21 = vmul.f32 %v3953_v42, %v5121_v0  ;;  %3972 = vrcp.f32 %v2728_v33 }
 0x23a   :  { %v3957_v22 = vpop.eup %3956  ;;  %v2787_v25 = vpack.c.bf16 %v2771_v15, %v2767_v14  ;;  %v2772_v26 = vmul.f32 %v3955_v16, %v5126_v3 }
 0x23b   :  { %v3959_v28 = vpop.eup %3958  ;;  %v2789_v30 = vpack.c.bf16 %v2773_v21, %v2769_v17  ;;  %v2774_v51 = vmul.f32 %v3957_v22, %v5129_v4 }
 0x23c   :  { %v2788_v63 = vpack.c.bf16 %v2772_v26, %v2768_v23  ;;  %v3961_v32 = vpop.eup %3960  ;;  %v2730_v52 = vadd.f32 1.0, %v3959_v28 }
 0x23d   :  { %v2790_v39 = vpack.c.bf16 %v2774_v51, %v2770_v29  ;;  %v2775_v40 = vmul.f32 %v3961_v32, %v5137_v18 }
 0x23e   :  { %2836 = vmatprep.subr.bf16.mxu0 %v2788_v63  ;;  %v3963_v0 = vpop.eup %3962  ;;  %3974 = vrcp.f32 %v2730_v52 }
 0x23f   :  { %2889 = vmatprep.subr.bf16.mxu1 %v2790_v39  ;;  %2837 = vmatpush1.bf16.msra.mxu0 %v2787_v25  ;;  %v3965_v57 = vpop.eup %3964  ;;  %v2779_v3 = vmul.f32 %v3963_v0, %v5147_v27 }
 0x240   :  { %2890 = vmatpush1.bf16.msra.mxu1 %v2789_v30  ;;  %v3967_v58 = vpop.eup %3966  ;;  %v2733_v4 = vadd.f32 1.0, %v3965_v57 }
 0x241   :  { %v3969_v43 = vpop.eup %3968  ;;  %v2791_v37 = vpack.c.bf16 %v2779_v3, %v2775_v40  ;;  %v2732_v45 = vadd.f32 1.0, %v3967_v58 }
 0x242   :  { %3976 = vrcp.f32 %v2733_v4  ;;  %v2734_v46 = vadd.f32 1.0, %v3969_v43  ;;  %v3971_v47 = vpop.eup %3970 }
 0x243   :  { %3978 = vrcp.f32 %v2732_v45  ;;  %v3973_v48 = vpop.eup %3972  ;;  %v2777_v53 = vmul.f32 %v3971_v47, %v5140_v19  ;;  %v3917_v19 = vld [vmem:[%s5211_s4 + $0x8] sm:$0xff]   ;;  %s4007_s4 = smov [#allocation2]  }
 0x244   :  { %3980 = vrcp.f32 %v2734_v46  ;;  %v2776_v55 = vmul.f32 %v3973_v48, %v5143_v24  ;;  %v2802_v24 = vpop.permute.xlu0 %2801  ;;  %s2963_s16 = sshll.u32 %s4007_s4, 4  ;;  %s2964_s16 = int_to_ptr.vmem [resolvable:$true] %s2963_s16 }
 0x245   :  { %s3982_s17 = scalar_lea.vmem %s2964_s16, 2048  ;;  %p3987_p1 = scmp.lt.s32.totalorder %s2964_s16, %s2964_s16 }
 0x246   :  { %p3983_p0 = scmp.ne.s32.totalorder %s2964_s16, %s3982_s17  ;;  %p3988_p2 = scmp.lt.s32.totalorder %s3982_s17, %s3982_s17 }
 0x248   :  { %v3975_v49 = vpop.eup %3974  ;;  %p3989_p3 = por %p3988_p2, %p3987_p1 }
 0x249   :  { %v2778_v59 = vmul.f32 %v3975_v49, %v5153_v44  ;;  %v2807_v44 = vpop.permute.xlu0 %2806 }
 0x24a   :  { %p3990_p4 = pnand %p3989_p3, %p3983_p0 }
 0x24c   :  { %v3977_v50 = vpop.eup %3976 }
 0x24d   :  { %v3979_v18 = vpop.eup %3978  ;;  %v2781_v27 = vmul.f32 %v3977_v50, %v5160_v34 }
 0x24e   :  { %v3981_v54 = vpop.eup %3980  ;;  %v2780_v56 = vmul.f32 %v3979_v18, %v5163_v35  ;;  %v2812_v35 = vpop.permute.xlu1 %2811 }
 0x24f   :  { %v2793_v60 = vpack.c.bf16 %v2781_v27, %v2777_v53  ;;  %v2782_v61 = vmul.f32 %v3981_v54, %v5166_v36 }
 0x250   :  { %v2792_v62 = vpack.c.bf16 %v2780_v56, %v2776_v55 }
 0x251   :  { %v2794_v1 = vpack.c.bf16 %v2782_v61, %v2778_v59 }
 0x252   :  { %2838 = vmatprep.subr.bf16.mxu0 %v2792_v62  ;;  %v2817_v16 = vpop.permute.xlu1 %2816 }
 0x253   :  { %2891 = vmatprep.subr.bf16.mxu1 %v2794_v1  ;;  %2839 = vmatpush1.bf16.msra.mxu0 %v2791_v37 }
 0x254   :  { %2892 = vmatpush1.bf16.msra.mxu1 %v2793_v60 }
 0x256   :  { %3332 = vmatmul.mubr.msk.bf16.vlgmr.msra.gmra.mrb[8].mxu0 %vm2829_vm0, %v3916_v2 }
 0x257   :  { %3334 = vmatmul.mubr.msk.bf16.vlgmr.msra.gmra.mrb[8].mxu1 %vm2829_vm0, %v3916_v2  ;;  %2878 = vmatprep.mubr.bf16.mxu0 %v4006_v20 }
 0x258   :  { %2931 = vmatprep.mubr.bf16.mxu1 %v4006_v20 }
 0x25e   :  { %3333 = vmatmul.mubr.msk.bf16.gmra.mrb[12].mxu0 %vm2829_vm0, %v3917_v19 }
 0x25f   :  { %3335 = vmatmul.mubr.msk.bf16.gmra.mrb[12].mxu1 %vm2829_vm0, %v3917_v19 }
 0x329   :  { %v2870_v34 = vpop.f32.mrb[8].mxu0 }
 0x32a   :  { %v2871_v36 = vadd.f32 %v2870_v34, %v2802_v24  ;;  %v2923_v5 = vpop.f32.mrb[8].mxu1  ;;  %v2872_v6 = vpop.f32.mrb[9].mxu0 }
 0x32b   :  { %v2924_v7 = vadd.f32 %v2923_v5, %v2802_v24  ;;  %v2873_v8 = vadd.f32 %v2872_v6, %v2802_v24  ;;  %v2925_v9 = vpop.f32.mrb[9].mxu1  ;;  %v2874_v38 = vpop.f32.mrb[10].mxu0 }
 0x32c   :  { %2942 = vst [vmem:[#allocation2] sm:$0xff] %v2871_v36  ;;  %v2926_v10 = vadd.f32 %v2925_v9, %v2802_v24  ;;  %v2927_v20 = vpop.f32.mrb[10].mxu1  ;;  %v2875_v11 = vadd.f32 %v2874_v38, %v2807_v44  ;;  %v2876_v41 = vpop.f32.mrb[11].mxu0 }
 0x32d   :  { %2944 = vst [vmem:[#allocation2 + $0x10] sm:$0xff] %v2924_v7  ;;  %2943 = vst [vmem:[#allocation2 + $0x8] sm:$0xff] %v2873_v8  ;;  %v2928_v12 = vadd.f32 %v2927_v20, %v2807_v44  ;;  %v2877_v13 = vadd.f32 %v2876_v41, %v2807_v44  ;;  %v2929_v42 = vpop.f32.mrb[11].mxu1 }
 0x32e   :  { %2945 = vst [vmem:[#allocation2 + $0x18] sm:$0xff] %v2926_v10  ;;  %2946 = vst [vmem:[#allocation2 + $0x20] sm:$0xff] %v2875_v11  ;;  %v2930_v14 = vadd.f32 %v2929_v42, %v2807_v44 }
 0x32f   :  { %2948 = vst [vmem:[#allocation2 + $0x30] sm:$0xff] %v2928_v12  ;;  %2947 = vst [vmem:[#allocation2 + $0x28] sm:$0xff] %v2877_v13 }
 0x330   :  { %2949 = vst [vmem:[#allocation2 + $0x38] sm:$0xff] %v2930_v14 }
 0x331   :  { %v2880_v15 = vpop.f32.mrb[12].mxu0 }
 0x332   :  { %v2881_v17 = vadd.f32 %v2880_v15, %v2812_v35  ;;  %v2933_v21 = vpop.f32.mrb[12].mxu1  ;;  %v2882_v22 = vpop.f32.mrb[13].mxu0 }
 0x333   :  { %v2934_v23 = vadd.f32 %v2933_v21, %v2812_v35  ;;  %v2883_v25 = vadd.f32 %v2882_v22, %v2812_v35  ;;  %v2935_v26 = vpop.f32.mrb[13].mxu1  ;;  %v2884_v28 = vpop.f32.mrb[14].mxu0 }
 0x334   :  { %2950 = vst [vmem:[#allocation2 + $0x40] sm:$0xff] %v2881_v17  ;;  %v2936_v29 = vadd.f32 %v2935_v26, %v2812_v35  ;;  %v2937_v30 = vpop.f32.mrb[14].mxu1  ;;  %v2885_v51 = vadd.f32 %v2884_v28, %v2817_v16  ;;  %v2886_v31 = vpop.f32.mrb[15].mxu0 }
 0x335   :  { %2952 = vst [vmem:[#allocation2 + $0x50] sm:$0xff] %v2934_v23  ;;  %2951 = vst [vmem:[#allocation2 + $0x48] sm:$0xff] %v2883_v25  ;;  %v2938_v63 = vadd.f32 %v2937_v30, %v2817_v16  ;;  %v2887_v32 = vadd.f32 %v2886_v31, %v2817_v16  ;;  %v2939_v33 = vpop.f32.mrb[15].mxu1 }
 0x336   :  { %2953 = vst [vmem:[#allocation2 + $0x58] sm:$0xff] %v2936_v29  ;;  %2954 = vst [vmem:[#allocation2 + $0x60] sm:$0xff] %v2885_v51  ;;  %v2940_v39 = vadd.f32 %v2939_v33, %v2817_v16 }
 0x337   :  { %2956 = vst [vmem:[#allocation2 + $0x70] sm:$0xff] %v2938_v63  ;;  %2955 = vst [vmem:[#allocation2 + $0x68] sm:$0xff] %v2887_v32 }
 0x338   :  { %2957 = vst [vmem:[#allocation2 + $0x78] sm:$0xff] %v2940_v39 }
 0x339   :  { %3993 = shalt.err (!%p3990_p4)
}
 0x33a   :  { %s3994_s20 = scalar_lea.hbm %s5213_s6, 2048 }
 0x33b   :  { %p3995_p5 = scmp.ne.s32.totalorder %s5213_s6, %s3994_s20  ;;  %p3998_p6 = scmp.lt.u32.totalorder %s3994_s20, %s5213_s6 }
 0x33d   :  { %p4000_p7 = pnand %p3998_p6, %p3995_p5 }
 0x33f   :  { %4003 = shalt.err (!%p4000_p7)
}
 0x340   :  { %s4008_s25 = smov 512   ;;  %s4009_s26 = smov 32  }
 0x341   :  { %2969 = dma.vmem_to_hbm [thread:$0]  %s2964_s16, 2048, %s5213_s6, [#allocation3], %s4008_s25, %s4008_s25, %s4009_s26  }
 0x342   :  { %4004 = dma.done.wait [#allocation3], 2048  }
 0x343   :  { %4005 = vsyncadd [#allocation3], 4294965248 }
 0x344   :  { %2973 = vsyncpa [#allocation3], 1 }

</bundles_post_ra>
